<compile_context>
chip_gen: v7x
topology: tpu7x:2x2x1
jax: 0.10.0
libtpu: 0.0.40
codegen_flags: <defaults>
</compile_context>

<pallas_src>
import functools

import jax
import jax.numpy as jnp
from jax import lax
from jax.experimental import pallas as pl
from jax.experimental.pallas import tpu as pltpu

# ----- model dims (small test config, structurally identical to OTModel defaults) -----
HIDDEN_DIM = 32      # hidden_dim   (768 in the reference)
STYLE_DIM = 16       # style_dim    (128)
CONTENT_DIM = 16     # content_dim  (128)  -- must equal STYLE_DIM for the gate mix
FEATURE_DIM = 7      # feature_dim
GATE_HIDDEN = 8      # gate_hidden  (64)
OT_BLUR = 0.05       # sinkhorn blur; eps = blur**p with p = 1
SINKHORN_ITERS = 20  # eps-annealed Sinkhorn (was 100 fixed-eps iterations)
VOCAB = 64

assert CONTENT_DIM == STYLE_DIM, "gate mix (1-g)*content + g*style requires equal dims"


# ============================ Pallas kernel 1: Sinkhorn OT ============================

def _lse(m, axis):
    mx = jnp.max(m, axis=axis, keepdims=True)
    return mx + jnp.log(jnp.sum(jnp.exp(m - mx), axis=axis, keepdims=True))


def _pairwise_l2(x, y):
    # x: (N, D), y: (M, D) -> (N, M) Euclidean distance (p = 1 ground cost).
    # bf16 inputs on the MXU matmul, f32 accumulation + f32 norm terms.
    xx = jnp.sum(x * x, axis=-1)                     # (N,)
    yy = jnp.sum(y * y, axis=-1)                     # (M,)
    xy = lax.dot_general(x.astype(jnp.bfloat16), y.astype(jnp.bfloat16),
                         dimension_numbers=(((1,), (1,)), ((), ())),
                         preferred_element_type=jnp.float32)   # (N, M)
    sq = xx[:, None] + yy[None, :] - 2.0 * xy
    return jnp.sqrt(jnp.maximum(sq, 0.0))


def sinkhorn_kernel(x0_ref, w0_ref, x1_ref, w1_ref, ot_ref, *, eps, n_iters):
    # One sample per grid step: refs are (1, L, D) / (1, 1, L) / (1, 1, 1).
    x0 = x0_ref[0]                       # (L, D)
    x1 = x1_ref[0]                       # (L, D)
    w0 = w0_ref[0]                       # (1, L)
    w1 = w1_ref[0]                       # (1, L)
    L = x0.shape[0]

    c_xy = _pairwise_l2(x0, x1)          # (L, L)
    c_xx = _pairwise_l2(x0, x0)
    c_yy = _pairwise_l2(x1, x1)

    neg_big = jnp.float32(-1e9)
    logw0 = jnp.where(w0 > 0, jnp.log(jnp.maximum(w0, 1e-30)), neg_big)   # (1, L)
    logw1 = jnp.where(w1 > 0, jnp.log(jnp.maximum(w1, 1e-30)), neg_big)   # (1, L)
    logw0_col = jnp.reshape(logw0, (L, 1))                                # (L, 1)

    # self-terms (xx, yy) stacked and solved with the symmetric (single-potential) update
    c_s = jnp.stack([c_xx, c_yy], axis=0)            # (2, L, L)
    logw_s = jnp.stack([logw0, logw1], axis=0)       # (2, 1, L)

    # eps-scaling (annealing): start at the cloud diameter, halve every iteration,
    # clamp at the target blur.  TODO(synk): geomloss additionally symmetrizes the xy
    # updates; here the xy term uses plain alternating updates under the same schedule.
    diam = jnp.maximum(jnp.max(c_xy), jnp.maximum(jnp.max(c_xx), jnp.max(c_yy)))
    eps0 = jnp.maximum(diam, eps)
    log_half = jnp.float32(-0.6931471805599453)

    f0 = jnp.zeros((L, 1), jnp.float32)
    g0 = jnp.zeros((1, L), jnp.float32)
    fs0 = jnp.zeros((2, 1, L), jnp.float32)

    def body(t, carry):
        f, g, fs = carry
        eps_t = jnp.maximum(eps, eps0 * jnp.exp(log_half * t.astype(jnp.float32)))
        inv_eps = 1.0 / eps_t
        # --- xy term: asymmetric alternating updates; C * inv_eps shared by both ---
        ct = c_xy * inv_eps                                         # (L, L)
        f = -eps_t * _lse(logw1 + g * inv_eps - ct, axis=1)         # (L, 1)
        g = -eps_t * _lse(logw0_col + f * inv_eps - ct, axis=0)     # (1, L)
        # --- xx & yy terms: one symmetric update on the stacked problems ---
        ts = -eps_t * _lse(logw_s + (fs - c_s) * inv_eps, axis=2)   # (2, L, 1)
        fs = 0.5 * (fs + jnp.reshape(ts, (2, 1, L)))                # (2, 1, L)
        return f, g, fs

    f, g, fs = lax.fori_loop(0, n_iters, body, (f0, g0, fs0))

    ot_xy = jnp.sum(w0 * jnp.reshape(f, (1, L))) + jnp.sum(w1 * g)
    ot_xx = 2.0 * jnp.sum(w0 * fs[0])
    ot_yy = 2.0 * jnp.sum(w1 * fs[1])
    # divergence is nonnegative; clamp so downstream log1p cannot NaN
    div = jnp.maximum(ot_xy - 0.5 * (ot_xx + ot_yy), 0.0)
    ot_ref[...] = jnp.reshape(div, (1, 1, 1))


def sinkhorn_divergence(x0, w0, x1, w1, *, eps=OT_BLUR, n_iters=SINKHORN_ITERS):
    B, L, D = x0.shape
    kern = functools.partial(sinkhorn_kernel, eps=eps, n_iters=n_iters)
    out = pl.pallas_call(
        kern,
        out_shape=jax.ShapeDtypeStruct((B, 1, 1), jnp.float32),
        grid=(B,),
        in_specs=[
            pl.BlockSpec((1, L, D), lambda b: (b, 0, 0)),
            pl.BlockSpec((1, 1, L), lambda b: (b, 0, 0)),
            pl.BlockSpec((1, L, D), lambda b: (b, 0, 0)),
            pl.BlockSpec((1, 1, L), lambda b: (b, 0, 0)),
        ],
        out_specs=pl.BlockSpec((1, 1, 1), lambda b: (b, 0, 0)),
        compiler_params=pltpu.CompilerParams(
            dimension_semantics=("parallel",),       # batch axis -> both TCs on v7x
            vmem_limit_bytes=64 * 1024 * 1024,       # per-sample working set only
        ),
    )(x0, w0.reshape(B, 1, L), x1, w1.reshape(B, 1, L))
    return out[:, 0, :]                              # (B, 1)


# ===================== Pallas kernel 2: fused post-encoder head =====================
# Parameters are packed: one (H, 2S) projection, full gate/classifier weights, and all
# row-vector params (biases / LN / ot_proj weight) stacked into two small buffers.

def head_kernel(cls_ref, feats_ref, ot_ref,
                wproj_ref, wf_ref, w1_ref, w2_ref, wcls_ref,
                vec_ref, misc_ref, out_ref):
    f32 = jnp.float32
    cls = cls_ref[...]                     # (B, H)
    feats = feats_ref[...]                 # (B, 2F)

    # packed row-vector params: [bc, bs, bf, bot, ln_g, ln_b, b2, wot]
    bc, bs, bf, bot = vec_ref[0:1, :], vec_ref[1:2, :], vec_ref[2:3, :], vec_ref[3:4, :]
    ln_g, ln_b, b2, wot = vec_ref[4:5, :], vec_ref[5:6, :], vec_ref[6:7, :], vec_ref[7:8, :]
    b1 = misc_ref[0:1, :GATE_HIDDEN]
    bcls = misc_ref[1:2, 0:1]

    # content / style projections fused into a single (H, 2S) matmul
    cs = jnp.dot(cls, wproj_ref[...], preferred_element_type=f32)       # (B, 2S)
    content = cs[:, :CONTENT_DIM] + bc
    style = cs[:, CONTENT_DIM:] + bs

    feat_emb = jnp.dot(feats, wf_ref[...], preferred_element_type=f32) + bf

    # ot_scalar = log1p(max(sinkhorn, 0)); ot_proj is Linear(1, S); then LayerNorm.
    ot_scalar = jnp.log(1.0 + jnp.maximum(ot_ref[...], 0.0))            # (B, 1)
    ot_lin = ot_scalar * wot + bot                                      # (B, S)
    mu = jnp.mean(ot_lin, axis=-1, keepdims=True)
    var = jnp.mean((ot_lin - mu) ** 2, axis=-1, keepdims=True)
    ot_emb = (ot_lin - mu) * lax.rsqrt(var + 1e-5) * ln_g + ln_b

    # gate_net on the concatenated representation: single (B,4S)x(4S,GH) matmul
    gate_in = jnp.concatenate([feat_emb, content, style, ot_emb], axis=-1)
    h = jnp.maximum(jnp.dot(gate_in, w1_ref[...], preferred_element_type=f32) + b1, 0.0)
    z = jnp.dot(h, w2_ref[...], preferred_element_type=f32) + b2
    gate = 1.0 / (1.0 + jnp.exp(-z))

    mix = (1.0 - gate) * content + gate * style
    rep = jnp.concatenate([mix, feat_emb, ot_emb], axis=-1)             # (B, 3S)
    out_ref[...] = jnp.dot(rep, wcls_ref[...], preferred_element_type=f32) + bcls


def head_forward(cls, feats, ot, p):
    B = cls.shape[0]
    args = (cls, feats, ot,
            p['wproj'], p['wf'], p['w1'], p['w2'], p['wcls'],
            p['vec_pack'], p['misc_pack'])
    # TODO(synk): at production batch sizes, grid this over B (>=128-row blocks) and/or
    # fuse it into the Sinkhorn pallas_call; at B=2 a single VMEM block is sufficient.
    return pl.pallas_call(
        head_kernel,
        out_shape=jax.ShapeDtypeStruct((B, 1), jnp.float32),
        in_specs=[pl.BlockSpec(memory_space=pltpu.MemorySpace.VMEM) for _ in args],
        out_specs=pl.BlockSpec(memory_space=pltpu.MemorySpace.VMEM),
    )(*args)


# ================================ parameters / glue ================================

def init_params(key):
    ks = jax.random.split(key, 10)

    def lin(k, din, dout):
        scale = 1.0 / jnp.sqrt(jnp.float32(din))
        kw, kb = jax.random.split(k)
        w = jax.random.uniform(kw, (din, dout), jnp.float32, -scale, scale)
        b = jax.random.uniform(kb, (1, dout), jnp.float32, -scale, scale)
        return w, b

    p = {}
    p['emb'] = 0.1 * jax.random.normal(ks[0], (VOCAB, HIDDEN_DIM), jnp.float32)
    wc, bc = lin(ks[1], HIDDEN_DIM, CONTENT_DIM)
    ws, bs = lin(ks[2], HIDDEN_DIM, STYLE_DIM)
    wf, bf = lin(ks[3], 2 * FEATURE_DIM, STYLE_DIM)
    wot, bot = lin(ks[4], 1, STYLE_DIM)
    ln_g = jnp.ones((1, STYLE_DIM), jnp.float32)
    ln_b = jnp.zeros((1, STYLE_DIM), jnp.float32)
    gate_in = STYLE_DIM + CONTENT_DIM + STYLE_DIM + STYLE_DIM
    w1, b1 = lin(ks[5], gate_in, GATE_HIDDEN)
    w2, b2 = lin(ks[6], GATE_HIDDEN, STYLE_DIM)
    wcls, bcls = lin(ks[7], 3 * STYLE_DIM, 1)

    p['wproj'] = jnp.concatenate([wc, ws], axis=1)                      # (H, 2S)
    p['wf'] = wf                                                        # (2F, S)
    p['w1'] = w1                                                        # (4S, GH)
    p['w2'] = w2                                                        # (GH, S)
    p['wcls'] = wcls                                                    # (3S, 1)
    p['vec_pack'] = jnp.concatenate([bc, bs, bf, bot, ln_g, ln_b, b2, wot], axis=0)  # (8,S)
    b1_pad = jnp.pad(b1, ((0, 0), (0, STYLE_DIM - GATE_HIDDEN)))
    bcls_pad = jnp.pad(bcls, ((0, 0), (0, STYLE_DIM - 1)))
    p['misc_pack'] = jnp.concatenate([b1_pad, bcls_pad], axis=0)        # (2, S)
    return p


@jax.jit
def ot_model_forward(params, input_ids, attention_mask, token_type_ids,
                     features1, features2):
    # --- "encoder" (deterministic embedding lookup; see TODO(synk) above) ---
    hid = params['emb'][input_ids]                                  # (B, L, H)
    hid = hid * attention_mask[..., None].astype(jnp.float32)
    cls = hid[:, 0, :]                                              # (B, H)
    feats = jnp.concatenate([features1, features2], axis=-1)        # (B, 2F)

    # --- _build_clouds: padded clouds expressed as full-length points + weights ---
    real = attention_mask == 1
    seg0 = real & (token_type_ids == 0)
    seg1 = real & (token_type_ids == 1)

    def cloud(seg):
        n = jnp.sum(seg, axis=-1)
        empty = n == 0
        onehot0 = jnp.zeros(seg.shape, jnp.float32).at[:, 0].set(1.0)
        w = jnp.where(empty[:, None], onehot0,
                      seg.astype(jnp.float32)
                      / jnp.maximum(n, 1)[:, None].astype(jnp.float32))
        x = jnp.where(empty[:, None, None], 0.0, hid)   # empty -> single zero point
        return x, w

    x0, w0 = cloud(seg0)
    x1, w1 = cloud(seg1)

    ot = sinkhorn_divergence(x0, w0, x1, w1)                        # (B, 1)
    logits = head_forward(cls, feats, ot, params)                   # (B, 1)
    return logits[:, 0]


if __name__ == "__main__":
    B, L = 2, 8
    key = jax.random.PRNGKey(0)
    kp, kid, kf1, kf2 = jax.random.split(key, 4)

    params = init_params(kp)
    input_ids = jax.random.randint(kid, (B, L), 0, VOCAB, dtype=jnp.int32)
    attention_mask = jnp.array([[1, 1, 1, 1, 1, 1, 1, 1],
                                [1, 1, 1, 1, 1, 1, 0, 0]], dtype=jnp.int32)
    token_type_ids = jnp.array([[0, 0, 0, 0, 1, 1, 1, 1],
                                [0, 0, 0, 1, 1, 1, 0, 0]], dtype=jnp.int32)
    features1 = jax.random.normal(kf1, (B, FEATURE_DIM), jnp.float32)
    features2 = jax.random.normal(kf2, (B, FEATURE_DIM), jnp.float32)

    logits = ot_model_forward(params, input_ids, attention_mask, token_type_ids,
                              features1, features2)
    logits = jax.block_until_ready(logits)
    assert logits.shape == (B,)
    assert bool(jnp.all(jnp.isfinite(logits)))
    print("KERNEL_OK")
</pallas_src>

<mosaic_0001>
module attributes {stable_mosaic.version = 11 : i64} {
  func.func @head_kernel(%arg0: memref<2x32xf32, #tpu.memory_space<vmem>>, %arg1: memref<2x14xf32, #tpu.memory_space<vmem>>, %arg2: memref<2x1xf32, #tpu.memory_space<vmem>>, %arg3: memref<32x32xf32, #tpu.memory_space<vmem>>, %arg4: memref<14x16xf32, #tpu.memory_space<vmem>>, %arg5: memref<64x8xf32, #tpu.memory_space<vmem>>, %arg6: memref<8x16xf32, #tpu.memory_space<vmem>>, %arg7: memref<48x1xf32, #tpu.memory_space<vmem>>, %arg8: memref<8x16xf32, #tpu.memory_space<vmem>>, %arg9: memref<2x16xf32, #tpu.memory_space<vmem>>, %arg10: memref<2x1xf32, #tpu.memory_space<vmem>>) attributes {dimension_semantics = [], scalar_prefetch = 0 : i64, scratch_operands = 0 : i64, tpu.core_type = #tpu.core_type<tc>} {
    %c0 = arith.constant 0 : index
    %c0_0 = arith.constant 0 : index
    %0 = vector.load %arg0[%c0, %c0_0] : memref<2x32xf32, #tpu.memory_space<vmem>>, vector<2x32xf32>
    %c0_1 = arith.constant 0 : index
    %c0_2 = arith.constant 0 : index
    %1 = vector.load %arg1[%c0_1, %c0_2] : memref<2x14xf32, #tpu.memory_space<vmem>>, vector<2x14xf32>
    %c0_3 = arith.constant 0 : index
    %c0_4 = arith.constant 0 : index
    %2 = vector.load %arg8[%c0_3, %c0_4] : memref<8x16xf32, #tpu.memory_space<vmem>>, vector<1x16xf32>
    %c1 = arith.constant 1 : index
    %c0_5 = arith.constant 0 : index
    %3 = vector.load %arg8[%c1, %c0_5] : memref<8x16xf32, #tpu.memory_space<vmem>>, vector<1x16xf32>
    %c2 = arith.constant 2 : index
    %c0_6 = arith.constant 0 : index
    %4 = vector.load %arg8[%c2, %c0_6] : memref<8x16xf32, #tpu.memory_space<vmem>>, vector<1x16xf32>
    %c3 = arith.constant 3 : index
    %c0_7 = arith.constant 0 : index
    %5 = vector.load %arg8[%c3, %c0_7] : memref<8x16xf32, #tpu.memory_space<vmem>>, vector<1x16xf32>
    %c4 = arith.constant 4 : index
    %c0_8 = arith.constant 0 : index
    %6 = vector.load %arg8[%c4, %c0_8] : memref<8x16xf32, #tpu.memory_space<vmem>>, vector<1x16xf32>
    %c5 = arith.constant 5 : index
    %c0_9 = arith.constant 0 : index
    %7 = vector.load %arg8[%c5, %c0_9] : memref<8x16xf32, #tpu.memory_space<vmem>>, vector<1x16xf32>
    %c6 = arith.constant 6 : index
    %c0_10 = arith.constant 0 : index
    %8 = vector.load %arg8[%c6, %c0_10] : memref<8x16xf32, #tpu.memory_space<vmem>>, vector<1x16xf32>
    %c7 = arith.constant 7 : index
    %c0_11 = arith.constant 0 : index
    %9 = vector.load %arg8[%c7, %c0_11] : memref<8x16xf32, #tpu.memory_space<vmem>>, vector<1x16xf32>
    %c0_12 = arith.constant 0 : index
    %c0_13 = arith.constant 0 : index
    %10 = vector.load %arg9[%c0_12, %c0_13] : memref<2x16xf32, #tpu.memory_space<vmem>>, vector<1x8xf32>
    %c1_14 = arith.constant 1 : index
    %c0_15 = arith.constant 0 : index
    %11 = vector.load %arg9[%c1_14, %c0_15] : memref<2x16xf32, #tpu.memory_space<vmem>>, vector<1x1xf32>
    %c0_16 = arith.constant 0 : index
    %c0_17 = arith.constant 0 : index
    %12 = vector.load %arg3[%c0_16, %c0_17] : memref<32x32xf32, #tpu.memory_space<vmem>>, vector<32x32xf32>
    %cst = arith.constant dense<0.000000e+00> : vector<2x32xf32>
    %13 = tpu.matmul %0, %12, %cst {dimension_numbers = #tpu.dot_dimension_numbers<[1], [0], [0], [1], [0, 0, 1, 1], [], []>} : vector<2x32xf32>, vector<32x32xf32>, vector<2x32xf32> -> vector<2x32xf32>
    %14 = vector.extract_strided_slice %13 {offsets = [0, 0], sizes = [2, 16], strides = [1, 1]} : vector<2x32xf32> to vector<2x16xf32>
    %15 = vector.broadcast %2 : vector<1x16xf32> to vector<2x16xf32>
    %16 = arith.addf %14, %15 : vector<2x16xf32>
    %17 = vector.extract_strided_slice %13 {offsets = [0, 16], sizes = [2, 16], strides = [1, 1]} : vector<2x32xf32> to vector<2x16xf32>
    %18 = vector.broadcast %3 : vector<1x16xf32> to vector<2x16xf32>
    %19 = arith.addf %17, %18 : vector<2x16xf32>
    %c0_18 = arith.constant 0 : index
    %c0_19 = arith.constant 0 : index
    %20 = vector.load %arg4[%c0_18, %c0_19] : memref<14x16xf32, #tpu.memory_space<vmem>>, vector<14x16xf32>
    %cst_20 = arith.constant dense<0.000000e+00> : vector<2x16xf32>
    %21 = tpu.matmul %1, %20, %cst_20 {dimension_numbers = #tpu.dot_dimension_numbers<[1], [0], [0], [1], [0, 0, 1, 1], [], []>} : vector<2x14xf32>, vector<14x16xf32>, vector<2x16xf32> -> vector<2x16xf32>
    %22 = vector.broadcast %4 : vector<1x16xf32> to vector<2x16xf32>
    %23 = arith.addf %21, %22 : vector<2x16xf32>
    %c0_21 = arith.constant 0 : index
    %c0_22 = arith.constant 0 : index
    %24 = vector.load %arg2[%c0_21, %c0_22] : memref<2x1xf32, #tpu.memory_space<vmem>>, vector<2x1xf32>
    %cst_23 = arith.constant 0.000000e+00 : f32
    %25 = vector.broadcast %cst_23 : f32 to vector<2x1xf32>
    %26 = arith.maximumf %24, %25 : vector<2x1xf32>
    %cst_24 = arith.constant 1.000000e+00 : f32
    %27 = vector.broadcast %cst_24 : f32 to vector<2x1xf32>
    %28 = arith.addf %27, %26 : vector<2x1xf32>
    %29 = math.log %28 : vector<2x1xf32>
    %30 = vector.broadcast %29 : vector<2x1xf32> to vector<2x16xf32>
    %31 = vector.broadcast %9 : vector<1x16xf32> to vector<2x16xf32>
    %32 = arith.mulf %30, %31 : vector<2x16xf32>
    %33 = vector.broadcast %5 : vector<1x16xf32> to vector<2x16xf32>
    %34 = arith.addf %32, %33 : vector<2x16xf32>
    %cst_25 = arith.constant dense<0.000000e+00> : vector<2xf32>
    %35 = vector.multi_reduction <add>, %34, %cst_25 [1] : vector<2x16xf32> to vector<2xf32>
    %36 = vector.shape_cast %35 : vector<2xf32> to vector<2x1xf32>
    %cst_26 = arith.constant 1.600000e+01 : f32
    %37 = vector.broadcast %cst_26 : f32 to vector<2x1xf32>
    %38 = arith.divf %36, %37 : vector<2x1xf32>
    %39 = vector.broadcast %38 : vector<2x1xf32> to vector<2x16xf32>
    %40 = arith.subf %34, %39 : vector<2x16xf32>
    %41 = arith.mulf %40, %40 : vector<2x16xf32>
    %cst_27 = arith.constant dense<0.000000e+00> : vector<2xf32>
    %42 = vector.multi_reduction <add>, %41, %cst_27 [1] : vector<2x16xf32> to vector<2xf32>
    %43 = vector.shape_cast %42 : vector<2xf32> to vector<2x1xf32>
    %cst_28 = arith.constant 1.600000e+01 : f32
    %44 = vector.broadcast %cst_28 : f32 to vector<2x1xf32>
    %45 = arith.divf %43, %44 : vector<2x1xf32>
    %46 = vector.broadcast %38 : vector<2x1xf32> to vector<2x16xf32>
    %47 = arith.subf %34, %46 : vector<2x16xf32>
    %cst_29 = arith.constant 9.99999974E-6 : f32
    %48 = vector.broadcast %cst_29 : f32 to vector<2x1xf32>
    %49 = arith.addf %45, %48 : vector<2x1xf32>
    %50 = math.rsqrt %49 : vector<2x1xf32>
    %51 = vector.broadcast %50 : vector<2x1xf32> to vector<2x16xf32>
    %52 = arith.mulf %47, %51 : vector<2x16xf32>
    %53 = vector.broadcast %6 : vector<1x16xf32> to vector<2x16xf32>
    %54 = arith.mulf %52, %53 : vector<2x16xf32>
    %55 = vector.broadcast %7 : vector<1x16xf32> to vector<2x16xf32>
    %56 = arith.addf %54, %55 : vector<2x16xf32>
    %57 = tpu.concatenate %23, %16, %19, %56 in 1 : vector<2x16xf32>, vector<2x16xf32>, vector<2x16xf32>, vector<2x16xf32> -> vector<2x64xf32>
    %c0_30 = arith.constant 0 : index
    %c0_31 = arith.constant 0 : index
    %58 = vector.load %arg5[%c0_30, %c0_31] : memref<64x8xf32, #tpu.memory_space<vmem>>, vector<64x8xf32>
    %cst_32 = arith.constant dense<0.000000e+00> : vector<2x8xf32>
    %59 = tpu.matmul %57, %58, %cst_32 {dimension_numbers = #tpu.dot_dimension_numbers<[1], [0], [0], [1], [0, 0, 1, 1], [], []>} : vector<2x64xf32>, vector<64x8xf32>, vector<2x8xf32> -> vector<2x8xf32>
    %60 = vector.broadcast %10 : vector<1x8xf32> to vector<2x8xf32>
    %61 = arith.addf %59, %60 : vector<2x8xf32>
    %cst_33 = arith.constant 0.000000e+00 : f32
    %62 = vector.broadcast %cst_33 : f32 to vector<2x8xf32>
    %63 = arith.maximumf %61, %62 : vector<2x8xf32>
    %c0_34 = arith.constant 0 : index
    %c0_35 = arith.constant 0 : index
    %64 = vector.load %arg6[%c0_34, %c0_35] : memref<8x16xf32, #tpu.memory_space<vmem>>, vector<8x16xf32>
    %cst_36 = arith.constant dense<0.000000e+00> : vector<2x16xf32>
    %65 = tpu.matmul %63, %64, %cst_36 {dimension_numbers = #tpu.dot_dimension_numbers<[1], [0], [0], [1], [0, 0, 1, 1], [], []>} : vector<2x8xf32>, vector<8x16xf32>, vector<2x16xf32> -> vector<2x16xf32>
    %66 = vector.broadcast %8 : vector<1x16xf32> to vector<2x16xf32>
    %67 = arith.addf %65, %66 : vector<2x16xf32>
    %cst_37 = arith.constant 0.000000e+00 : f32
    %68 = vector.broadcast %cst_37 : f32 to vector<2x16xf32>
    %69 = arith.subf %68, %67 : vector<2x16xf32>
    %70 = math.exp %69 : vector<2x16xf32>
    %cst_38 = arith.constant 1.000000e+00 : f32
    %71 = vector.broadcast %cst_38 : f32 to vector<2x16xf32>
    %72 = arith.addf %71, %70 : vector<2x16xf32>
    %cst_39 = arith.constant 1.000000e+00 : f32
    %73 = vector.broadcast %cst_39 : f32 to vector<2x16xf32>
    %74 = arith.divf %73, %72 : vector<2x16xf32>
    %cst_40 = arith.constant 1.000000e+00 : f32
    %75 = vector.broadcast %cst_40 : f32 to vector<2x16xf32>
    %76 = arith.subf %75, %74 : vector<2x16xf32>
    %77 = arith.mulf %76, %16 : vector<2x16xf32>
    %78 = arith.mulf %74, %19 : vector<2x16xf32>
    %79 = arith.addf %77, %78 : vector<2x16xf32>
    %80 = tpu.concatenate %79, %23, %56 in 1 : vector<2x16xf32>, vector<2x16xf32>, vector<2x16xf32> -> vector<2x48xf32>
    %c0_41 = arith.constant 0 : index
    %c0_42 = arith.constant 0 : index
    %81 = vector.load %arg7[%c0_41, %c0_42] : memref<48x1xf32, #tpu.memory_space<vmem>>, vector<48x1xf32>
    %cst_43 = arith.constant dense<0.000000e+00> : vector<2x1xf32>
    %82 = tpu.matmul %80, %81, %cst_43 {dimension_numbers = #tpu.dot_dimension_numbers<[1], [0], [0], [1], [0, 0, 1, 1], [], []>} : vector<2x48xf32>, vector<48x1xf32>, vector<2x1xf32> -> vector<2x1xf32>
    %83 = vector.broadcast %11 : vector<1x1xf32> to vector<2x1xf32>
    %84 = arith.addf %82, %83 : vector<2x1xf32>
    %c0_44 = arith.constant 0 : index
    %c0_45 = arith.constant 0 : index
    %85 = vector.load %arg10[%c0_44, %c0_45] : memref<2x1xf32, #tpu.memory_space<vmem>>, vector<2x1xf32>
    tpu.vector_store %arg10[%c0_44, %c0_45], %84 {strides = array<i32>} : memref<2x1xf32, #tpu.memory_space<vmem>>, vector<2x1xf32>,
    return
  }
}

module attributes {stable_mosaic.version = 11 : i64} {
  func.func @sinkhorn_kernel(%arg0: i32, %arg1: memref<1x8x32xf32, #tpu.memory_space<vmem>>, %arg2: memref<1x1x8xf32, #tpu.memory_space<vmem>>, %arg3: memref<1x8x32xf32, #tpu.memory_space<vmem>>, %arg4: memref<1x1x8xf32, #tpu.memory_space<vmem>>, %arg5: memref<1x1x1xf32, #tpu.memory_space<vmem>>) attributes {dimension_semantics = [#tpu.dimension_semantics<parallel>], iteration_bounds = array<i64: 2>, scalar_prefetch = 0 : i64, scratch_operands = 0 : i64, tpu.core_type = #tpu.core_type<tc>, window_params = [{transform_indices = @transform_0, window_bounds = array<i64: 1, 8, 32>}, {transform_indices = @transform_1, window_bounds = array<i64: 1, 1, 8>}, {transform_indices = @transform_2, window_bounds = array<i64: 1, 8, 32>}, {transform_indices = @transform_3, window_bounds = array<i64: 1, 1, 8>}, {transform_indices = @transform_4, window_bounds = array<i64: 1, 1, 1>}]} {
    %c0 = arith.constant 0 : index
    %c0_0 = arith.constant 0 : index
    %c0_1 = arith.constant 0 : index
    %0 = vector.load %arg1[%c0, %c0_0, %c0_1] : memref<1x8x32xf32, #tpu.memory_space<vmem>>, vector<1x8x32xf32>
    %1 = vector.shape_cast %0 : vector<1x8x32xf32> to vector<8x32xf32>
    %c0_2 = arith.constant 0 : index
    %c0_3 = arith.constant 0 : index
    %c0_4 = arith.constant 0 : index
    %2 = vector.load %arg3[%c0_2, %c0_3, %c0_4] : memref<1x8x32xf32, #tpu.memory_space<vmem>>, vector<1x8x32xf32>
    %3 = vector.shape_cast %2 : vector<1x8x32xf32> to vector<8x32xf32>
    %c0_5 = arith.constant 0 : index
    %c0_6 = arith.constant 0 : index
    %c0_7 = arith.constant 0 : index
    %4 = vector.load %arg2[%c0_5, %c0_6, %c0_7] : memref<1x1x8xf32, #tpu.memory_space<vmem>>, vector<1x1x8xf32>
    %5 = vector.shape_cast %4 : vector<1x1x8xf32> to vector<1x8xf32>
    %c0_8 = arith.constant 0 : index
    %c0_9 = arith.constant 0 : index
    %c0_10 = arith.constant 0 : index
    %6 = vector.load %arg4[%c0_8, %c0_9, %c0_10] : memref<1x1x8xf32, #tpu.memory_space<vmem>>, vector<1x1x8xf32>
    %7 = vector.shape_cast %6 : vector<1x1x8xf32> to vector<1x8xf32>
    %8 = arith.mulf %1, %1 : vector<8x32xf32>
    %cst = arith.constant dense<0.000000e+00> : vector<8xf32>
    %9 = vector.multi_reduction <add>, %8, %cst [1] : vector<8x32xf32> to vector<8xf32>
    %10 = arith.mulf %3, %3 : vector<8x32xf32>
    %cst_11 = arith.constant dense<0.000000e+00> : vector<8xf32>
    %11 = vector.multi_reduction <add>, %10, %cst_11 [1] : vector<8x32xf32> to vector<8xf32>
    %12 = arith.truncf %1 : vector<8x32xf32> to vector<8x32xbf16>
    %13 = arith.truncf %3 : vector<8x32xf32> to vector<8x32xbf16>
    %cst_12 = arith.constant dense<0.000000e+00> : vector<8x8xf32>
    %14 = tpu.matmul %12, %13, %cst_12 {dimension_numbers = #tpu.dot_dimension_numbers<[1], [1], [0], [0], [0, 0, 1, 0], [], []>} : vector<8x32xbf16>, vector<8x32xbf16>, vector<8x8xf32> -> vector<8x8xf32>
    %15 = vector.shape_cast %9 : vector<8xf32> to vector<8x1xf32>
    %16 = vector.shape_cast %11 : vector<8xf32> to vector<1x8xf32>
    %17 = vector.broadcast %15 : vector<8x1xf32> to vector<8x8xf32>
    %18 = vector.broadcast %16 : vector<1x8xf32> to vector<8x8xf32>
    %19 = arith.addf %17, %18 : vector<8x8xf32>
    %cst_13 = arith.constant 2.000000e+00 : f32
    %20 = vector.broadcast %cst_13 : f32 to vector<8x8xf32>
    %21 = arith.mulf %20, %14 : vector<8x8xf32>
    %22 = arith.subf %19, %21 : vector<8x8xf32>
    %cst_14 = arith.constant 0.000000e+00 : f32
    %23 = vector.broadcast %cst_14 : f32 to vector<8x8xf32>
    %24 = arith.maximumf %22, %23 : vector<8x8xf32>
    %25 = math.sqrt %24 : vector<8x8xf32>
    %26 = arith.mulf %1, %1 : vector<8x32xf32>
    %cst_15 = arith.constant dense<0.000000e+00> : vector<8xf32>
    %27 = vector.multi_reduction <add>, %26, %cst_15 [1] : vector<8x32xf32> to vector<8xf32>
    %28 = arith.mulf %1, %1 : vector<8x32xf32>
    %cst_16 = arith.constant dense<0.000000e+00> : vector<8xf32>
    %29 = vector.multi_reduction <add>, %28, %cst_16 [1] : vector<8x32xf32> to vector<8xf32>
    %30 = arith.truncf %1 : vector<8x32xf32> to vector<8x32xbf16>
    %31 = arith.truncf %1 : vector<8x32xf32> to vector<8x32xbf16>
    %cst_17 = arith.constant dense<0.000000e+00> : vector<8x8xf32>
    %32 = tpu.matmul %30, %31, %cst_17 {dimension_numbers = #tpu.dot_dimension_numbers<[1], [1], [0], [0], [0, 0, 1, 0], [], []>} : vector<8x32xbf16>, vector<8x32xbf16>, vector<8x8xf32> -> vector<8x8xf32>
    %33 = vector.shape_cast %27 : vector<8xf32> to vector<8x1xf32>
    %34 = vector.shape_cast %29 : vector<8xf32> to vector<1x8xf32>
    %35 = vector.broadcast %33 : vector<8x1xf32> to vector<8x8xf32>
    %36 = vector.broadcast %34 : vector<1x8xf32> to vector<8x8xf32>
    %37 = arith.addf %35, %36 : vector<8x8xf32>
    %cst_18 = arith.constant 2.000000e+00 : f32
    %38 = vector.broadcast %cst_18 : f32 to vector<8x8xf32>
    %39 = arith.mulf %38, %32 : vector<8x8xf32>
    %40 = arith.subf %37, %39 : vector<8x8xf32>
    %cst_19 = arith.constant 0.000000e+00 : f32
    %41 = vector.broadcast %cst_19 : f32 to vector<8x8xf32>
    %42 = arith.maximumf %40, %41 : vector<8x8xf32>
    %43 = math.sqrt %42 : vector<8x8xf32>
    %44 = arith.mulf %3, %3 : vector<8x32xf32>
    %cst_20 = arith.constant dense<0.000000e+00> : vector<8xf32>
    %45 = vector.multi_reduction <add>, %44, %cst_20 [1] : vector<8x32xf32> to vector<8xf32>
    %46 = arith.mulf %3, %3 : vector<8x32xf32>
    %cst_21 = arith.constant dense<0.000000e+00> : vector<8xf32>
    %47 = vector.multi_reduction <add>, %46, %cst_21 [1] : vector<8x32xf32> to vector<8xf32>
    %48 = arith.truncf %3 : vector<8x32xf32> to vector<8x32xbf16>
    %49 = arith.truncf %3 : vector<8x32xf32> to vector<8x32xbf16>
    %cst_22 = arith.constant dense<0.000000e+00> : vector<8x8xf32>
    %50 = tpu.matmul %48, %49, %cst_22 {dimension_numbers = #tpu.dot_dimension_numbers<[1], [1], [0], [0], [0, 0, 1, 0], [], []>} : vector<8x32xbf16>, vector<8x32xbf16>, vector<8x8xf32> -> vector<8x8xf32>
    %51 = vector.shape_cast %45 : vector<8xf32> to vector<8x1xf32>
    %52 = vector.shape_cast %47 : vector<8xf32> to vector<1x8xf32>
    %53 = vector.broadcast %51 : vector<8x1xf32> to vector<8x8xf32>
    %54 = vector.broadcast %52 : vector<1x8xf32> to vector<8x8xf32>
    %55 = arith.addf %53, %54 : vector<8x8xf32>
    %cst_23 = arith.constant 2.000000e+00 : f32
    %56 = vector.broadcast %cst_23 : f32 to vector<8x8xf32>
    %57 = arith.mulf %56, %50 : vector<8x8xf32>
    %58 = arith.subf %55, %57 : vector<8x8xf32>
    %cst_24 = arith.constant 0.000000e+00 : f32
    %59 = vector.broadcast %cst_24 : f32 to vector<8x8xf32>
    %60 = arith.maximumf %58, %59 : vector<8x8xf32>
    %61 = math.sqrt %60 : vector<8x8xf32>
    %cst_25 = arith.constant 0.000000e+00 : f32
    %62 = vector.broadcast %cst_25 : f32 to vector<1x8xf32>
    %63 = arith.cmpf ogt, %5, %62 : vector<1x8xf32>
    %cst_26 = arith.constant 1.000000e-30 : f32
    %64 = vector.broadcast %cst_26 : f32 to vector<1x8xf32>
    %65 = arith.maximumf %5, %64 : vector<1x8xf32>
    %66 = math.log %65 : vector<1x8xf32>
    %cst_27 = arith.constant -1.000000e+09 : f32
    %67 = vector.broadcast %cst_27 : f32 to vector<1x8xf32>
    %68 = arith.select %63, %66, %67 : vector<1x8xi1>, vector<1x8xf32>
    %cst_28 = arith.constant 0.000000e+00 : f32
    %69 = vector.broadcast %cst_28 : f32 to vector<1x8xf32>
    %70 = arith.cmpf ogt, %7, %69 : vector<1x8xf32>
    %cst_29 = arith.constant 1.000000e-30 : f32
    %71 = vector.broadcast %cst_29 : f32 to vector<1x8xf32>
    %72 = arith.maximumf %7, %71 : vector<1x8xf32>
    %73 = math.log %72 : vector<1x8xf32>
    %cst_30 = arith.constant -1.000000e+09 : f32
    %74 = vector.broadcast %cst_30 : f32 to vector<1x8xf32>
    %75 = arith.select %70, %73, %74 : vector<1x8xi1>, vector<1x8xf32>
    %76 = vector.shape_cast %68 : vector<1x8xf32> to vector<8x1xf32>
    %77 = vector.shape_cast %43 : vector<8x8xf32> to vector<1x8x8xf32>
    %78 = vector.shape_cast %61 : vector<8x8xf32> to vector<1x8x8xf32>
    %79 = tpu.concatenate %77, %78 in 0 : vector<1x8x8xf32>, vector<1x8x8xf32> -> vector<2x8x8xf32>
    %80 = vector.shape_cast %68 : vector<1x8xf32> to vector<1x1x8xf32>
    %81 = vector.shape_cast %75 : vector<1x8xf32> to vector<1x1x8xf32>
    %82 = tpu.concatenate %80, %81 in 0 : vector<1x1x8xf32>, vector<1x1x8xf32> -> vector<2x1x8xf32>
    %83 = vector.shape_cast %25 : vector<8x8xf32> to vector<1x8x8xf32>
    %cst_31 = arith.constant dense<0xFF800000> : vector<1xf32>
    %84 = vector.multi_reduction <maximumf>, %83, %cst_31 [1, 2] : vector<1x8x8xf32> to vector<1xf32>
    %85 = vector.shape_cast %84 : vector<1xf32> to vector<1x1x1xf32>
    %86 = vector.extract %85[0, 0, 0] : f32 from vector<1x1x1xf32>
    %87 = vector.shape_cast %43 : vector<8x8xf32> to vector<1x8x8xf32>
    %cst_32 = arith.constant dense<0xFF800000> : vector<1xf32>
    %88 = vector.multi_reduction <maximumf>, %87, %cst_32 [1, 2] : vector<1x8x8xf32> to vector<1xf32>
    %89 = vector.shape_cast %88 : vector<1xf32> to vector<1x1x1xf32>
    %90 = vector.extract %89[0, 0, 0] : f32 from vector<1x1x1xf32>
    %91 = vector.shape_cast %61 : vector<8x8xf32> to vector<1x8x8xf32>
    %cst_33 = arith.constant dense<0xFF800000> : vector<1xf32>
    %92 = vector.multi_reduction <maximumf>, %91, %cst_33 [1, 2] : vector<1x8x8xf32> to vector<1xf32>
    %93 = vector.shape_cast %92 : vector<1xf32> to vector<1x1x1xf32>
    %94 = vector.extract %93[0, 0, 0] : f32 from vector<1x1x1xf32>
    %95 = arith.maximumf %90, %94 : f32
    %96 = arith.maximumf %86, %95 : f32
    %cst_34 = arith.constant 5.000000e-02 : f32
    %97 = arith.maximumf %96, %cst_34 : f32
    %cst_35 = arith.constant 0.000000e+00 : f32
    %98 = vector.broadcast %cst_35 : f32 to vector<8x1xf32>
    %cst_36 = arith.constant 0.000000e+00 : f32
    %99 = vector.broadcast %cst_36 : f32 to vector<1x8xf32>
    %cst_37 = arith.constant 0.000000e+00 : f32
    %100 = vector.broadcast %cst_37 : f32 to vector<2x1x8xf32>
    %cst_38 = arith.constant -0.693147182 : f32
    %c0_i32 = arith.constant 0 : i32
    %c20_i32 = arith.constant 20 : i32
    %101 = arith.addi %c0_i32, %c20_i32 : i32
    %c1_i32 = arith.constant 1 : i32
    %102:3 = scf.for %arg6 = %c0_i32 to %101 step %c1_i32 iter_args(%arg7 = %98, %arg8 = %99, %arg9 = %100) -> (vector<8x1xf32>, vector<1x8xf32>, vector<2x1x8xf32>)  : i32 {
      %137 = arith.sitofp %arg6 : i32 to f32
      %138 = arith.mulf %cst_38, %137 : f32
      %139 = math.exp %138 : f32
      %140 = arith.mulf %97, %139 : f32
      %cst_51 = arith.constant 5.000000e-02 : f32
      %141 = arith.maximumf %cst_51, %140 : f32
      %cst_52 = arith.constant 1.000000e+00 : f32
      %142 = arith.divf %cst_52, %141 : f32
      %143 = vector.broadcast %142 : f32 to vector<8x8xf32>
      %144 = arith.mulf %25, %143 : vector<8x8xf32>
      %cst_53 = arith.constant 0.000000e+00 : f32
      %145 = arith.subf %cst_53, %141 : f32
      %146 = vector.broadcast %142 : f32 to vector<1x8xf32>
      %147 = arith.mulf %arg8, %146 : vector<1x8xf32>
      %148 = arith.addf %75, %147 : vector<1x8xf32>
      %149 = vector.broadcast %148 : vector<1x8xf32> to vector<8x8xf32>
      %150 = arith.subf %149, %144 : vector<8x8xf32>
      %cst_54 = arith.constant dense<0xFF800000> : vector<8xf32>
      %151 = vector.multi_reduction <maximumf>, %150, %cst_54 [1] : vector<8x8xf32> to vector<8xf32>
      %152 = vector.shape_cast %151 : vector<8xf32> to vector<8x1xf32>
      %153 = vector.broadcast %152 : vector<8x1xf32> to vector<8x8xf32>
      %154 = arith.subf %150, %153 : vector<8x8xf32>
      %155 = math.exp %154 : vector<8x8xf32>
      %cst_55 = arith.constant dense<0.000000e+00> : vector<8xf32>
      %156 = vector.multi_reduction <add>, %155, %cst_55 [1] : vector<8x8xf32> to vector<8xf32>
      %157 = vector.shape_cast %156 : vector<8xf32> to vector<8x1xf32>
      %158 = math.log %157 : vector<8x1xf32>
      %159 = arith.addf %152, %158 : vector<8x1xf32>
      %160 = vector.broadcast %145 : f32 to vector<8x1xf32>
      %161 = arith.mulf %160, %159 : vector<8x1xf32>
      %cst_56 = arith.constant 0.000000e+00 : f32
      %162 = arith.subf %cst_56, %141 : f32
      %163 = vector.broadcast %142 : f32 to vector<8x1xf32>
      %164 = arith.mulf %161, %163 : vector<8x1xf32>
      %165 = arith.addf %76, %164 : vector<8x1xf32>
      %166 = vector.broadcast %165 : vector<8x1xf32> to vector<8x8xf32>
      %167 = arith.subf %166, %144 : vector<8x8xf32>
      %cst_57 = arith.constant dense<0xFF800000> : vector<8xf32>
      %168 = vector.multi_reduction <maximumf>, %167, %cst_57 [0] : vector<8x8xf32> to vector<8xf32>
      %169 = vector.shape_cast %168 : vector<8xf32> to vector<1x8xf32>
      %170 = vector.broadcast %169 : vector<1x8xf32> to vector<8x8xf32>
      %171 = arith.subf %167, %170 : vector<8x8xf32>
      %172 = math.exp %171 : vector<8x8xf32>
      %cst_58 = arith.constant dense<0.000000e+00> : vector<8xf32>
      %173 = vector.multi_reduction <add>, %172, %cst_58 [0] : vector<8x8xf32> to vector<8xf32>
      %174 = vector.shape_cast %173 : vector<8xf32> to vector<1x8xf32>
      %175 = math.log %174 : vector<1x8xf32>
      %176 = arith.addf %169, %175 : vector<1x8xf32>
      %177 = vector.broadcast %162 : f32 to vector<1x8xf32>
      %178 = arith.mulf %177, %176 : vector<1x8xf32>
      %cst_59 = arith.constant 0.000000e+00 : f32
      %179 = arith.subf %cst_59, %141 : f32
      %180 = vector.broadcast %arg9 : vector<2x1x8xf32> to vector<2x8x8xf32>
      %181 = arith.subf %180, %79 : vector<2x8x8xf32>
      %182 = vector.broadcast %142 : f32 to vector<2x8x8xf32>
      %183 = arith.mulf %181, %182 : vector<2x8x8xf32>
      %184 = vector.broadcast %82 : vector<2x1x8xf32> to vector<2x8x8xf32>
      %185 = arith.addf %184, %183 : vector<2x8x8xf32>
      %cst_60 = arith.constant dense<0xFF800000> : vector<2x8xf32>
      %186 = vector.multi_reduction <maximumf>, %185, %cst_60 [2] : vector<2x8x8xf32> to vector<2x8xf32>
      %187 = vector.shape_cast %186 : vector<2x8xf32> to vector<2x8x1xf32>
      %188 = vector.broadcast %187 : vector<2x8x1xf32> to vector<2x8x8xf32>
      %189 = arith.subf %185, %188 : vector<2x8x8xf32>
      %190 = math.exp %189 : vector<2x8x8xf32>
      %cst_61 = arith.constant dense<0.000000e+00> : vector<2x8xf32>
      %191 = vector.multi_reduction <add>, %190, %cst_61 [2] : vector<2x8x8xf32> to vector<2x8xf32>
      %192 = vector.shape_cast %191 : vector<2x8xf32> to vector<2x8x1xf32>
      %193 = math.log %192 : vector<2x8x1xf32>
      %194 = arith.addf %187, %193 : vector<2x8x1xf32>
      %195 = vector.broadcast %179 : f32 to vector<2x8x1xf32>
      %196 = arith.mulf %195, %194 : vector<2x8x1xf32>
      %197 = vector.shape_cast %196 : vector<2x8x1xf32> to vector<2x1x8xf32>
      %198 = arith.addf %arg9, %197 : vector<2x1x8xf32>
      %cst_62 = arith.constant 5.000000e-01 : f32
      %199 = vector.broadcast %cst_62 : f32 to vector<2x1x8xf32>
      %200 = arith.mulf %199, %198 : vector<2x1x8xf32>
      scf.yield %161, %178, %200 : vector<8x1xf32>, vector<1x8xf32>, vector<2x1x8xf32>
    }
    %c20_i32_39 = arith.constant 20 : i32
    %103 = vector.shape_cast %102#0 : vector<8x1xf32> to vector<1x8xf32>
    %104 = arith.mulf %5, %103 : vector<1x8xf32>
    %105 = vector.shape_cast %104 : vector<1x8xf32> to vector<1x1x8xf32>
    %cst_40 = arith.constant dense<0.000000e+00> : vector<1xf32>
    %106 = vector.multi_reduction <add>, %105, %cst_40 [1, 2] : vector<1x1x8xf32> to vector<1xf32>
    %107 = vector.shape_cast %106 : vector<1xf32> to vector<1x1x1xf32>
    %108 = vector.extract %107[0, 0, 0] : f32 from vector<1x1x1xf32>
    %109 = arith.mulf %7, %102#1 : vector<1x8xf32>
    %110 = vector.shape_cast %109 : vector<1x8xf32> to vector<1x1x8xf32>
    %cst_41 = arith.constant dense<0.000000e+00> : vector<1xf32>
    %111 = vector.multi_reduction <add>, %110, %cst_41 [1, 2] : vector<1x1x8xf32> to vector<1xf32>
    %112 = vector.shape_cast %111 : vector<1xf32> to vector<1x1x1xf32>
    %113 = vector.extract %112[0, 0, 0] : f32 from vector<1x1x1xf32>
    %114 = arith.addf %108, %113 : f32
    %115 = vector.extract_strided_slice %102#2 {offsets = [0, 0, 0], sizes = [1, 1, 8], strides = [1, 1, 1]} : vector<2x1x8xf32> to vector<1x1x8xf32>
    %116 = vector.shape_cast %115 : vector<1x1x8xf32> to vector<1x8xf32>
    %117 = arith.mulf %5, %116 : vector<1x8xf32>
    %118 = vector.shape_cast %117 : vector<1x8xf32> to vector<1x1x8xf32>
    %cst_42 = arith.constant dense<0.000000e+00> : vector<1xf32>
    %119 = vector.multi_reduction <add>, %118, %cst_42 [1, 2] : vector<1x1x8xf32> to vector<1xf32>
    %120 = vector.shape_cast %119 : vector<1xf32> to vector<1x1x1xf32>
    %121 = vector.extract %120[0, 0, 0] : f32 from vector<1x1x1xf32>
    %cst_43 = arith.constant 2.000000e+00 : f32
    %122 = arith.mulf %cst_43, %121 : f32
    %123 = vector.extract_strided_slice %102#2 {offsets = [1, 0, 0], sizes = [1, 1, 8], strides = [1, 1, 1]} : vector<2x1x8xf32> to vector<1x1x8xf32>
    %124 = vector.shape_cast %123 : vector<1x1x8xf32> to vector<1x8xf32>
    %125 = arith.mulf %7, %124 : vector<1x8xf32>
    %126 = vector.shape_cast %125 : vector<1x8xf32> to vector<1x1x8xf32>
    %cst_44 = arith.constant dense<0.000000e+00> : vector<1xf32>
    %127 = vector.multi_reduction <add>, %126, %cst_44 [1, 2] : vector<1x1x8xf32> to vector<1xf32>
    %128 = vector.shape_cast %127 : vector<1xf32> to vector<1x1x1xf32>
    %129 = vector.extract %128[0, 0, 0] : f32 from vector<1x1x1xf32>
    %cst_45 = arith.constant 2.000000e+00 : f32
    %130 = arith.mulf %cst_45, %129 : f32
    %131 = arith.addf %122, %130 : f32
    %cst_46 = arith.constant 5.000000e-01 : f32
    %132 = arith.mulf %cst_46, %131 : f32
    %133 = arith.subf %114, %132 : f32
    %cst_47 = arith.constant 0.000000e+00 : f32
    %134 = arith.maximumf %133, %cst_47 : f32
    %135 = vector.broadcast %134 : f32 to vector<1x1x1xf32>
    %c0_48 = arith.constant 0 : index
    %c0_49 = arith.constant 0 : index
    %c0_50 = arith.constant 0 : index
    %136 = vector.load %arg5[%c0_48, %c0_49, %c0_50] : memref<1x1x1xf32, #tpu.memory_space<vmem>>, vector<1x1x1xf32>
    tpu.vector_store %arg5[%c0_48, %c0_49, %c0_50], %135 {strides = array<i32>} : memref<1x1x1xf32, #tpu.memory_space<vmem>>, vector<1x1x1xf32>,
    return
  }
  func.func @transform_0(%arg0: i32) -> (i32, i32, i32) {
    %c0_i32 = arith.constant 0 : i32
    %c0_i32_0 = arith.constant 0 : i32
    %c0_i32_1 = arith.constant 0 : i32
    return %arg0, %c0_i32, %c0_i32_0 : i32, i32, i32
  }
  func.func @transform_1(%arg0: i32) -> (i32, i32, i32) {
    %c0_i32 = arith.constant 0 : i32
    %c0_i32_0 = arith.constant 0 : i32
    %c0_i32_1 = arith.constant 0 : i32
    return %arg0, %c0_i32, %c0_i32_0 : i32, i32, i32
  }
  func.func @transform_2(%arg0: i32) -> (i32, i32, i32) {
    %c0_i32 = arith.constant 0 : i32
    %c0_i32_0 = arith.constant 0 : i32
    %c0_i32_1 = arith.constant 0 : i32
    return %arg0, %c0_i32, %c0_i32_0 : i32, i32, i32
  }
  func.func @transform_3(%arg0: i32) -> (i32, i32, i32) {
    %c0_i32 = arith.constant 0 : i32
    %c0_i32_0 = arith.constant 0 : i32
    %c0_i32_1 = arith.constant 0 : i32
    return %arg0, %c0_i32, %c0_i32_0 : i32, i32, i32
  }
  func.func @transform_4(%arg0: i32) -> (i32, i32, i32) {
    %c0_i32 = arith.constant 0 : i32
    %c0_i32_0 = arith.constant 0 : i32
    %c0_i32_1 = arith.constant 0 : i32
    return %arg0, %c0_i32, %c0_i32_0 : i32, i32, i32
  }
}

</mosaic_0001>

<bundles_post_ra>
// kernel: ot_model_forward.3
= control target key start
LH: loop header
LB: loop body
LE: loop exit
PB: predicated region body
PF: predicated region fallthrough
CT: control target
= control target key end

     0   :  { %v710_v0 = vmov 0   ;;  %v711_v6 = vmov 0.0|0.0   ;;  %vm712_vm0 = vmmov 0   ;;  %v713_v10 = vmov 0.0   ;;  %s715_s13 = smov 16   ;;  %s716_s12 = smov 48   ;;  %s917_s2 = inlined_call_operand.vmem [shape: f32[2,1], index: 2, kind: input, shape index: {}]   ;;  %s918_s3 = inlined_call_operand.vmem [shape: f32[32,32], index: 3, kind: input, shape index: {}]   ;;  %s919_s0 = inlined_call_operand.vmem [shape: f32[2,32], index: 0, kind: input, shape index: {}]   ;;  %s920_s8 = inlined_call_operand.vmem [shape: f32[8,16], index: 8, kind: input, shape index: {}]   ;;  %s921_s4 = inlined_call_operand.vmem [shape: f32[14,16], index: 4, kind: input, shape index: {}]   ;;  %s922_s1 = inlined_call_operand.vmem [shape: f32[2,14], index: 1, kind: input, shape index: {}]   ;;  %s923_s5 = inlined_call_operand.vmem [shape: f32[64,8], index: 5, kind: input, shape index: {}]   ;;  %s924_s6 = inlined_call_operand.vmem [shape: f32[8,16], index: 6, kind: input, shape index: {}]   ;;  %s925_s9 = inlined_call_operand.vmem [shape: f32[2,16], index: 9, kind: input, shape index: {}]   ;;  %s926_s7 = inlined_call_operand.vmem [shape: f32[48,1], index: 7, kind: input, shape index: {}]   ;;  %s927_s10 = inlined_call_operand.vmem [shape: f32[2,1], index: 10, kind: output, shape index: {}]  }
   0x1   :  { %701 = vset.pattern.permute.xlu0 %v710_v0  ;;  %v223_v1 = vld [vmem:[%s917_s2] sm:$0x3]  ;;  %661 = vmatprep.subr.bf16.mxu0 %v711_v6  ;;  %v48_v8 = vld [vmem:[%s918_s3 + $0x8] sm:$0xff]  ;;  %v49_v9 = vld [vmem:[%s918_s3 + $0x10] sm:$0xff]  ;;  %vm51_vm1 = vcmask 261120   ;;  %vm243_vm2 = vcmask 123904  }
   0x2   :  { %v224_v2 = vmax.f32 %v223_v1, 0.0  ;;  %v47_v7 = vld [vmem:[%s918_s3] sm:$0xff]  ;;  %612 = vmatprep.mubr.msk.f32.mxu0 %vm712_vm0, %v713_v10  ;;  %v50_v12 = vld [vmem:[%s918_s3 + $0x18] sm:$0xff]  ;;  %667 = vmatprep.subr.bf16.mxu1 %v711_v6  ;;  %vm149_vm3 = vcmask 1045504   ;;  %v140_v22 = vld [vmem:[%s921_s4 + $0x8] sm:$0x3f] }
   0x3   :  { %v662_v11 = vpack.c.bf16 %v48_v8, %v47_v7  ;;  %619 = vmatprep.mubr.msk.f32.mxu1 %vm712_vm0, %v713_v10  ;;  %v665_v13 = vpack.c.bf16 %v50_v12, %v49_v9  ;;  %v35_v14 = vld [vmem:[%s919_s0] sm:$0x3]  ;;  %v568_v15 = vld [vmem:[%s920_s8 + $0x7] ss:$0 sm:$0xff]  ;;  %v569_v17 = vld [vmem:[%s920_s8 + $0x3] ss:$0 sm:$0xff] }
   0x4   :  { %v225_v3 = vadd.f32 1.0, %v224_v2  ;;  %v139_v21 = vld [vmem:[%s921_s4] sm:$0xff]  ;;  %vm714_vm4 = vmmov 1   ;;  %vm145_vm6 = vcmask 113664   ;;  %v286_v36 = vld [vmem:[%s923_s5 + $0x8] sm:$0xff]  ;;  %v287_v37 = vld [vmem:[%s923_s5 + $0x10] sm:$0xff] }
   0x5   :  { %663 = vmatpush3.bf16.msra.mxu0 %v662_v11  ;;  %vm669_vm5 = vmpackc.low %vm149_vm3, %vm714_vm4  ;;  %v668_v23 = vpack.c.bf16 %v140_v22, %v139_v21  ;;  %v36_v24 = vld [vmem:[%s922_s1] sm:$0x3]  ;;  %v288_v39 = vld [vmem:[%s923_s5 + $0x18] sm:$0xff]  ;;  %s717_s1 = smov 112   ;;  %s718_s14 = smov 32   ;;  %vm280_vm7 = vcmask 130048  }
   0x6   :  { %702 = vlog2.f32 %v225_v3  ;;  %664 = vmatprep.subr.bf16.mxu0 %v711_v6  ;;  %v564_v30 = vld [vmem:[%s920_s8 + $0x1] ss:$0 sm:$0xff]  ;;  %v563_v31 = vld [vmem:[%s920_s8] ss:$0 sm:$0xff]  ;;  %v675_v40 = vpack.c.bf16 %v288_v39, %v287_v37  ;;  %v565_v41 = vld [vmem:[%s920_s8 + $0x2] ss:$0 sm:$0xff] }
   0x7   :  { %670 = vmatpush3.bf16.msk.msra.mxu1 %vm669_vm5, %v668_v23  ;;  %v285_v35 = vld [vmem:[%s923_s5] sm:$0xff]  ;;  %v290_v46 = vld [vmem:[%s923_s5 + $0x28] sm:$0xff]  ;;  %v291_v47 = vld [vmem:[%s923_s5 + $0x30] sm:$0xff]  ;;  %vm283_vm8 = vcmask 392192   ;;  %vm297_vm9 = vcmask 523264   ;;  %vm377_vm10 = vcmask 64512  }
   0x8   :  { %671 = vmatprep.subr.bf16.mxu1 %v711_v6  ;;  %v672_v38 = vpack.c.bf16 %v286_v36, %v285_v35  ;;  %v289_v45 = vld [vmem:[%s923_s5 + $0x20] sm:$0xff]  ;;  %v292_v49 = vld [vmem:[%s923_s5 + $0x38] sm:$0xff]  ;;  %vm556_vm11 = vcmask 1024  }
   0x9   :  { %666 = vmatpush3.bf16.msra.mxu0 %v665_v13  ;;  %v678_v48 = vpack.c.bf16 %v290_v46, %v289_v45  ;;  %v681_v50 = vpack.c.bf16 %v292_v49, %v291_v47  ;;  %v570_v57 = vld [vmem:[%s920_s8 + $0x4] ss:$0 sm:$0xff]  ;;  %v571_v59 = vld [vmem:[%s920_s8 + $0x5] ss:$0 sm:$0xff]  ;;  %v474_v13 = vld [vmem:[%s926_s7 + $0x8] sm:$0xff] }
   0xa   :  { %641 = vmatprep.subr.mxu0 %v713_v10  ;;  %620 = vmatmul.mubr.msk.f32.vlgmr.msra.gmra.mrb[0].mxu1 %vm145_vm6, %v36_v24  ;;  %v473_v12 = vld [vmem:[%s926_s7] sm:$0xff] }
   0xb   :  { %638 = vmatprep.mubr.msk.f32.mxu1 %vm712_vm0, %v713_v10  ;;  %673 = vmatpush3.bf16.msra.mxu1 %v672_v38  ;;  %v576_v38 = vld [vmem:[%s925_s9 + $0x1] ss:$0 sm:$0xff] }
   0xc   :  { %613 = vmatmul.mubr.msk.f32.vlgmr.msra.gmra.mrb[0].mxu0 %vm51_vm1, %v35_v14  ;;  %674 = vmatprep.subr.bf16.mxu1 %v711_v6  ;;  %v684_v14 = vpack.c.bf16 %v474_v13, %v473_v12 }
   0xd   :  { %643 = vmatprep.mubr.msk.f32.mxu0 %vm712_vm0, %v713_v10 }
   0xf   :  { %676 = vmatpush3.bf16.msra.mxu1 %v675_v40 }
  0x10   :  { %v703_v4 = vpop.eup %702  ;;  %677 = vmatprep.subr.bf16.mxu1 %v711_v6 }
  0x11   :  { %v227_v5 = vmul.f32 0.6931472, %v703_v4  ;;  %v372_v4 = vld [vmem:[%s924_s6] sm:$0xff] }
  0x12   :  { %642 = vmatpush3.msra.mxu0 %v372_v4 }
  0x13   :  { %230 = vperm.xlu0 %701, %v227_v5   ;;  %679 = vmatpush3.bf16.msra.mxu1 %v678_v48  ;;  %v572_v5 = vld [vmem:[%s925_s9] ss:$0 sm:$0xff] }
  0x14   :  { %680 = vmatprep.subr.bf16.mxu1 %v711_v6  ;;  %683 = vmatprep.subr.bf16.mxu0 %v711_v6 }
  0x17   :  { %682 = vmatpush3.bf16.msra.mxu1 %v681_v50 }
  0x92   :  { %v231_v16 = vpop.permute.xlu0 %230 }
  0x93   :  { %v237_v18 = vmul.f32 %v568_v15, %v231_v16  ;;  %v475_v15 = vld [vmem:[%s926_s7 + $0x10] sm:$0xff] }
  0x95   :  { %v242_v19 = vadd.f32 %v569_v17, %v237_v18  ;;  %v477_v17 = vld [vmem:[%s926_s7 + $0x20] sm:$0xff]  ;;  %v478_v18 = vld [vmem:[%s926_s7 + $0x28] sm:$0xff] }
  0x97   :  { %v244_v20 = vsel %vm243_vm2, %v242_v19, 0.0 }
  0x98   :  { %245 = vadd.xlane.f32.xlu0 %v244_v20  ;;  %v574_v20 = vld [vmem:[%s920_s8 + $0x6] ss:$0 sm:$0xff] }
  0xdd   :  { %v219_v42 = vpop.f32.mrb[0].mxu1 }
  0xde   :  { %v220_v43 = vadd.f32 %v565_v41, %v219_v42  ;;  %v621_v44 = vpop.f32.mrb[1].mxu1 }
  0xdf   :  { %v121_v32 = vpop.f32.mrb[0].mxu0 }
  0xe0   :  { %v830_v33 = vadd.f32 %v563_v31, %v121_v32  ;;  %v614_v34 = vpop.f32.mrb[1].mxu0  ;;  %465 = vrot.lane.b32.xlu0 %v220_v43, %s715_s13 }
 0x125   :  { %v246_v25 = vpop.xlane.xlu0 %245 }
 0x126   :  { %v248_v26 = vmul.f32 0.0625, %v246_v25 }
 0x128   :  { %v249_v27 = vsub.f32 %v242_v19, %v248_v26  ;;  %v690_v19 = vpack.c.bf16 %v478_v18, %v477_v17 }
 0x12a   :  { %v250_v28 = vmul.f32 %v249_v27, %v249_v27 }
 0x12c   :  { %v251_v29 = vsel %vm243_vm2, %v250_v28, 0.0 }
 0x12d   :  { %252 = vadd.xlane.f32.xlu1 %v251_v29 }
 0x13e   :  { %135 = vrot.lane.b32.xlu1 %v564_v30, %s715_s13 }
 0x142   :  { %269 = vrot.lane.b32.xlu1 %v830_v33, %s715_s13 }
 0x152   :  { %v466_v34 = vpop.permute.xlu0 %465 }
 0x1ba   :  { %v253_v51 = vpop.xlane.xlu1 %252 }
 0x1bb   :  { %v254_v52 = vmul.f32 0.0625, %v253_v51 }
 0x1bd   :  { %v255_v53 = vadd.f32 1e-05, %v254_v52 }
 0x1be   :  { %v136_v54 = vpop.permute.xlu1 %135 }
 0x1bf   :  { %704 = vrsqrt.f32 %v255_v53  ;;  %v138_v55 = vadd.f32 %v136_v54, %v121_v32 }
 0x1c1   :  { %273 = vrot.lane.b32.xlu1 %v138_v55, %s715_s13 }
 0x1c2   :  { %v270_v62 = vpop.permute.xlu1 %269 }
 0x1c3   :  { %v281_v0 = vsel %vm280_vm7, %v220_v43, %v270_v62 }
 0x1c9   :  { %v705_v56 = vpop.eup %704 }
 0x1ca   :  { %v257_v58 = vmul.f32 %v705_v56, %v249_v27 }
 0x1cc   :  { %v262_v60 = vmul.f32 %v570_v57, %v257_v58 }
 0x1ce   :  { %v267_v61 = vadd.f32 %v571_v59, %v262_v60 }
 0x1d0   :  { %277 = vrot.lane.b32.xlu1 %v267_v61, %s716_s12 }
 0x1d4   :  { %459 = vrot.lane.b32.xlu1 %v138_v55, %s717_s1 }
 0x1d8   :  { %468 = vrot.lane.b32.xlu1 %v267_v61, %s718_s14 }
 0x233   :  { %v274_v63 = vpop.permute.xlu1 %273 }
 0x234   :  { %v282_v1 = vsel %vm51_vm1, %v281_v0, %v274_v63 }
 0x242   :  { %v278_v2 = vpop.permute.xlu1 %277 }
 0x243   :  { %v284_v3 = vsel %vm283_vm8, %v282_v1, %v278_v2 }
 0x244   :  { %639 = vmatmul.mubr.msk.f32.vlgmr.msra.gmra.mrb[2].mxu1 %vm297_vm9, %v284_v3 }
 0x246   :  { %v460_v29 = vpop.permute.xlu1 %459 }
 0x24a   :  { %v469_v35 = vpop.permute.xlu1 %468 }
 0x317   :  { %v367_v7 = vpop.f32.mrb[2].mxu1 }
 0x318   :  { %v368_v8 = vadd.f32 %v572_v5, %v367_v7  ;;  %v640_v9 = vpop.f32.mrb[3].mxu1 }
 0x31a   :  { %v371_v11 = vmax.f32 %v368_v8, 0.0 }
 0x31c   :  { %644 = vmatmul.mubr.msk.f32.vlgmr.msra.gmra.mrb[2].mxu0 %vm377_vm10, %v371_v11 }
 0x31d   :  { %658 = vmatprep.mubr.msk.f32.mxu0 %vm712_vm0, %v713_v10  ;;  %685 = vmatpush3.bf16.msra.mxu0 %v684_v14  ;;  %v476_v10 = vld [vmem:[%s926_s7 + $0x18] sm:$0xff] }
 0x31e   :  { %686 = vmatprep.subr.bf16.mxu0 %v711_v6  ;;  %v687_v16 = vpack.c.bf16 %v476_v10, %v475_v15 }
 0x321   :  { %688 = vmatpush3.bf16.msra.mxu0 %v687_v16 }
 0x322   :  { %689 = vmatprep.subr.bf16.mxu0 %v711_v6 }
 0x325   :  { %691 = vmatpush3.bf16.msra.mxu0 %v690_v19 }
 0x3ef   :  { %v447_v21 = vpop.f32.mrb[2].mxu0 }
 0x3f0   :  { %v448_v22 = vadd.f32 %v574_v20, %v447_v21  ;;  %v645_v23 = vpop.f32.mrb[3].mxu0 }
 0x3f2   :  { %v451_v24 = vsub.f32 0.0, %v448_v22 }
 0x3f4   :  { %v452_v25 = vmul.f32 1.442695, %v451_v24 }
 0x3f6   :  { %706 = vpow2.f32 %v452_v25 }
 0x400   :  { %v707_v26 = vpop.eup %706 }
 0x401   :  { %v454_v27 = vadd.f32 1.0, %v707_v26 }
 0x403   :  { %708 = vrcp.f32 %v454_v27 }
 0x40d   :  { %v709_v28 = vpop.eup %708 }
 0x40e   :  { %v457_v30 = vsub.f32 1.0, %v709_v28  ;;  %v462_v6 = vmul.f32 %v709_v28, %v460_v29 }
 0x410   :  { %v458_v31 = vmul.f32 %v457_v30, %v830_v33 }
 0x412   :  { %v463_v32 = vadd.f32 %v462_v6, %v458_v31 }
 0x414   :  { %v471_v36 = vsel %vm280_vm7, %v463_v32, %v466_v34 }
 0x415   :  { %v472_v37 = vsel %vm51_vm1, %v471_v36, %v469_v35 }
 0x416   :  { %659 = vmatmul.mubr.msk.f32.vlgmr.msra.gmra.mrb[4].mxu0 %vm283_vm8, %v472_v37 }
 0x4e9   :  { %v552_v39 = vpop.f32.mrb[4].mxu0 }
 0x4ea   :  { %v553_v40 = vadd.f32 %v576_v38, %v552_v39  ;;  %v660_v41 = vpop.f32.mrb[5].mxu0 }
 0x4ec   :  { %557 = vst.msk [vmem:[%s927_s10] sm:$0x3] %vm556_vm11, %v553_v40 }

// kernel: ot_model_forward.2
= control target key start
LH: loop header
LB: loop body
LE: loop exit
PB: predicated region body
PF: predicated region fallthrough
CT: control target
= control target key end

     0   :  { %s2562_s0 = inlined_call_operand.hbm [shape: f32[2,8,32], index: 0, kind: input, shape index: {}]   ;;  %s2563_s1 = inlined_call_operand.hbm [shape: f32[2,1,8], index: 1, kind: input, shape index: {}]   ;;  %s2564_s2 = inlined_call_operand.hbm [shape: f32[2,8,32], index: 2, kind: input, shape index: {}]   ;;  %s2565_s3 = inlined_call_operand.hbm [shape: f32[2,1,8], index: 3, kind: input, shape index: {}]   ;;  %s2566_s4 = inlined_call_operand.hbm [shape: f32[2,1,1], index: 4, kind: output, shape index: {}]  }
   0x1   :  { %2574 = sst [smem:[#allocation15_spill]] %s2562_s0 }
   0x2   :  { %2575 = sst [smem:[#allocation16_spill]] %s2563_s1 }
   0x3   :  { %9 = vsyncpa [#allocation3], 0 }
   0x4   :  { %11 = vsyncpa [#allocation3 + $0x1], 0 }
   0x5   :  { %12 = vsyncpa [#allocation6], 0 }
   0x6   :  { %14 = vsyncpa [#allocation6 + $0x1], 0 }
   0x7   :  { %15 = vsyncpa [#allocation9], 0 }
   0x8   :  { %17 = vsyncpa [#allocation9 + $0x1], 0 }
   0x9   :  { %18 = vsyncpa [#allocation4], 0 }
   0xa   :  { %20 = vsyncpa [#allocation4 + $0x1], 0  ;;  %s1978_s15 = smov 0   ;;  %s1980_s16 = smov 0  }
   0xb   :  { %s1982_s17 = smov 0   ;;  %s1984_s18 = smov 0  }
   0xc LB: > { %s1999_s19 = sadd.s32 4294967295, %s1922_s18   ;;  %s1517_s20 = sadd.s32 4294967294, %s1922_s18   ;;  %s1922_s18 = sphi %s1984_s18, %s2603_s18   ;;  %s1918_s17 = sphi %s1982_s17, %s2602_s17   ;;  %s1914_s16 = sphi %s1980_s16, %s2601_s16   ;;  %s1910_s15 = sphi %s1978_s15, %s2600_s15  }
   0xd   : > { %s2003_s21 = sadd.s32 1, %s1922_s18   ;;  %s33_s22 = sadd.s32 1, %s1918_s17 }
   0xe   : > { %s30_s23 = ssub.s32 %s1922_s18, %s2003_s21  ;;  %p40_p0 = scmp.ne.s32.totalorder %s1918_s17, %s1914_s16 }
   0xf   : > { %p31_p1 = scmp.eq.s32.totalorder %s30_s23, 0  ;;  %p41_p2 = scmp.eq.s32.totalorder %s1922_s18, 0 }
  0x10   : > { %p46_p3 = scmp.ne.s32.totalorder %s1914_s16, %s1910_s15  ;;  %p47_p4 = scmp.eq.s32.totalorder %s1999_s19, 0 }
  0x11   : > { %s2015_s24 = scalar_select %p31_p1, %s1918_s17, %s33_s22  }
  0x12   : > { %p42_p5 = por %p41_p2, %p40_p0  ;;  %p2017_p6 = por %p47_p4, %p46_p3 }
  0x13   : > { %p148_p7 = scmp.eq.s32.totalorder %s1999_s19, 1  ;;  %p154_p8 = scmp.eq.s32.totalorder %s1517_s20, 1 }
  0x14   : > { %s2576_s25 = scalar_select %p2017_p6, 1, 0 }
  0x15   : > { %p1604_p10 = scmp.lt.s32.totalorder %s1922_s18, 2  ;;  %p2024_p11 = por %p148_p7, %p40_p0 }
  0x16   : > { %p2028_p12 = por %p154_p8, %p46_p3  ;;  %s2033_s28 = sand.u32 1, %s1918_s17  }
  0x17   : > { %s2577_s26 = scalar_select %p2024_p11, 1, 0 }
  0x18   : > { %s2578_s27 = scalar_select %p2028_p12, 1, 0 }
  0x19   : > { %p2035_p13 = pnand %p1604_p10, %p42_p5  ;;  %s192_s30 = sand.u32 1, %s1922_s18  }
  0x1a   : > { %s2569_s5 = sshll.u32 %s1922_s18, 4  ;;  %s195_s6 = scalar_lea.vmem [#allocation5], %s2033_s28 }
  0x1b   : > { %s2579_s29 = scalar_select %p2035_p13, 1, 0 }
  0x1c   : > { %s202_s7 = sshll.u32 %s195_s6, 4  ;;  %s2580_s1 = sld [smem:[#allocation16_spill]]  ;;  %s2049_s7 = int_to_ptr.vmem [resolvable:$true] %s202_s7 }
  0x1d   : > { %s2051_s11 = scalar_lea.sflag [#allocation6], %s192_s30  ;;  %p2057_p1 = pneg %p2035_p13 }
  0x22   : > { %s2047_s10 = scalar_lea.hbm %s2580_s1, %s2569_s5  ;;  %s1717_s22 = scalar_lea.hbm %s2580_s1, 32 }
  0x23   : > { %s1712_s12 = scalar_lea.hbm %s2047_s10, 16  ;;  %p1718_p4 = scmp.lt.u32.totalorder %s2047_s10, %s2580_s1 }
  0x24   : > { %p1713_p0 = scmp.ne.s32.totalorder %s2047_s10, %s1712_s12  ;;  %p1719_p5 = scmp.lt.u32.totalorder %s1717_s22, %s1712_s12 }
  0x25   : > { %p1721_p8 = scmp.lt.u32.totalorder %s1712_s12, %s2047_s10 }
  0x26   : > { %p1715_p2 = pnand %p2057_p1, %p1713_p0  ;;  %p1720_p7 = por %p1719_p5, %p1718_p4 }
  0x28   : > { %p1716_p3 = pneg %p1715_p2  ;;  %p1722_p10 = por %p1721_p8, %p1720_p7 }
  0x2a   : > { %p1723_p9 = pnand %p1722_p10, %p1716_p3 }
  0x2c   : > { %1726 = shalt.err (!%p1723_p9)
}
  0x2d   : > { %s1727_s30 = scalar_lea.vmem %s2049_s7, 16  ;;  %s1940_s8 = smov [#allocation5]  }
  0x2e   : > { %p1728_p0 = scmp.ne.s32.totalorder %s2049_s7, %s1727_s30  ;;  %s1732_s9 = sshll.u32 %s1940_s8, 4  ;;  %s1733_s9 = int_to_ptr.vmem [resolvable:$false] %s1732_s9 }
  0x2f   : > { %s1734_s14 = scalar_lea.vmem %s1733_s9, 32  ;;  %p1735_p11 = scmp.lt.s32.totalorder %s2049_s7, %s1733_s9 }
  0x30   : > { %p1730_p2 = pnand %p1728_p0, %p2057_p1  ;;  %p1736_p6 = scmp.lt.s32.totalorder %s1734_s14, %s1727_s30 }
  0x32   : > { %p1731_p12 = pneg %p1730_p2  ;;  %p1737_p4 = por %p1736_p6, %p1735_p11 }
  0x34   : > { %p1738_p5 = pnand %p1737_p4, %p1731_p12 }
  0x36   : > { %1741 = shalt.err (!%p1738_p5)
}
  0x37   : > { %1593 = dma.hbm_to_vmem [thread:$0]  (!%p2035_p13), %s2047_s10, 16, %s2049_s7, %s2051_s11  }
  0x38   : > { %p1526_p9 = scmp.ge.s32.totalorder %s1922_s18, 1  ;;  %p242_p3 = scmp.lt.s32.totalorder %s1922_s18, 3 }
  0x39   : > { %s2570_s12 = sshll.u32 %s2033_s28, 3  ;;  %s2571_s22 = sshll.u32 %s1922_s18, 7 }
  0x3a   : > { %p2084_p6 = pnand %p1526_p9, %p242_p3  ;;  %s178_s23 = scalar_lea.vmem [#allocation2], %s2570_s12 }
  0x3b   : > { %s185_s6 = sshll.u32 %s178_s23, 4  ;;  %s2583_s0 = sld [smem:[#allocation15_spill]]  ;;  %s186_s6 = int_to_ptr.vmem [resolvable:$true] %s185_s6 }
  0x3c   : > { %s2582_s20 = scalar_select %p2084_p6, 1, 0 }
  0x3d   : > { %s175_s7 = scalar_lea.sflag [#allocation3], %s2033_s28 }
  0x41   : > { %s2096_s9 = scalar_lea.hbm %s2583_s0, %s2571_s22  ;;  %s1747_s23 = scalar_lea.hbm %s2583_s0, 256 }
  0x42   : > { %s1742_s10 = scalar_lea.hbm %s2096_s9, 128  ;;  %p1748_p8 = scmp.lt.u32.totalorder %s2096_s9, %s2583_s0 }
  0x43   : > { %p1743_p11 = scmp.ne.s32.totalorder %s2096_s9, %s1742_s10  ;;  %p1749_p10 = scmp.lt.u32.totalorder %s1747_s23, %s1742_s10 }
  0x44   : > { %p1751_p2 = scmp.lt.u32.totalorder %s1742_s10, %s2096_s9 }
  0x45   : > { %p1745_p12 = pnand %p1743_p11, %p2057_p1  ;;  %p1750_p0 = por %p1749_p10, %p1748_p8 }
  0x47   : > { %p1746_p7 = pneg %p1745_p12  ;;  %p1752_p4 = por %p1751_p2, %p1750_p0 }
  0x49   : > { %p1753_p5 = pnand %p1752_p4, %p1746_p7 }
  0x4b   : > { %1756 = shalt.err (!%p1753_p5)
}
  0x4c   : > { %s1757_s30 = scalar_lea.vmem %s186_s6, 128  ;;  %s1941_s8 = smov [#allocation2]  }
  0x4d   : > { %p1758_p9 = scmp.ne.s32.totalorder %s186_s6, %s1757_s30  ;;  %s1762_s22 = sshll.u32 %s1941_s8, 4  ;;  %s1763_s22 = int_to_ptr.vmem [resolvable:$false] %s1762_s22 }
  0x4e   : > { %s1764_s5 = scalar_lea.vmem %s1763_s22, 256  ;;  %p1765_p12 = scmp.lt.s32.totalorder %s186_s6, %s1763_s22 }
  0x4f   : > { %p1760_p3 = pnand %p1758_p9, %p2057_p1  ;;  %p1766_p6 = scmp.lt.s32.totalorder %s1764_s5, %s1757_s30 }
  0x51   : > { %p1761_p11 = pneg %p1760_p3  ;;  %p1767_p13 = por %p1766_p6, %p1765_p12 }
  0x53   : > { %p1768_p8 = pnand %p1767_p13, %p1761_p11 }
  0x55   : > { %1771 = shalt.err (!%p1768_p8)
}
  0x56   : > { %p2584_p10 = scmp.ne.s32.totalorder %s2579_s29, 0  ;;  %s2585_s1 = sshll.u32 %s1922_s18, 7 }
  0x57   : > { %s2121_s14 = scalar_lea.hbm %s2564_s2, %s2585_s1  ;;  %s2586_s23 = sshll.u32 %s2033_s28, 3 }
  0x58   : > { %1590 = dma.hbm_to_vmem [thread:$0]  (!%p2584_p10), %s2096_s9, 128, %s186_s6, %s175_s7  }
  0x59   : > { %s213_s22 = scalar_lea.vmem [#allocation7], %s2586_s23  ;;  %s1772_s8 = scalar_lea.hbm %s2121_s14, 128 }
  0x5a   : > { %s220_s30 = sshll.u32 %s213_s22, 4  ;;  %p1773_p13 = scmp.ne.s32.totalorder %s2121_s14, %s1772_s8  ;;  %s221_s30 = int_to_ptr.vmem [resolvable:$true] %s220_s30 }
  0x5b   : > { %s1777_s7 = scalar_lea.hbm %s2564_s2, 256  ;;  %p1778_p0 = scmp.lt.u32.totalorder %s2121_s14, %s2564_s2 }
  0x5c   : > { %p1775_p6 = pnand %p1773_p13, %p2057_p1  ;;  %p1779_p2 = scmp.lt.u32.totalorder %s1777_s7, %s1772_s8 }
  0x5d   : > { %p1781_p5 = scmp.lt.u32.totalorder %s1772_s8, %s2121_s14 }
  0x5e   : > { %p1776_p7 = pneg %p1775_p6  ;;  %p1780_p4 = por %p1779_p2, %p1778_p0 }
  0x60   : > { %p1782_p9 = por %p1781_p5, %p1780_p4 }
  0x62   : > { %p1783_p3 = pnand %p1782_p9, %p1776_p7 }
  0x64   : > { %1786 = shalt.err (!%p1783_p3)
}
  0x65   : > { %s1787_s12 = scalar_lea.vmem %s221_s30, 128  ;;  %s1942_s10 = smov [#allocation7]  }
  0x66   : > { %p1788_p11 = scmp.ne.s32.totalorder %s221_s30, %s1787_s12  ;;  %s1792_s23 = sshll.u32 %s1942_s10, 4  ;;  %s1793_s23 = int_to_ptr.vmem [resolvable:$false] %s1792_s23 }
  0x67   : > { %s1794_s22 = scalar_lea.vmem %s1793_s23, 256  ;;  %p1795_p13 = scmp.lt.s32.totalorder %s221_s30, %s1793_s23 }
  0x68   : > { %p1790_p12 = pnand %p1788_p11, %p2057_p1  ;;  %p1796_p6 = scmp.lt.s32.totalorder %s1794_s22, %s1787_s12 }
  0x6a   : > { %p1791_p8 = pneg %p1790_p12  ;;  %p1797_p10 = por %p1796_p6, %p1795_p13 }
  0x6c   : > { %p1798_p0 = pnand %p1797_p10, %p1791_p8 }
  0x6e   : > { %1801 = shalt.err (!%p1798_p0)
}
  0x6f   : > { %p2587_p2 = scmp.ne.s32.totalorder %s2579_s29, 0  ;;  %s2588_s8 = sshll.u32 %s1922_s18, 4 }
  0x70   : > { %s2148_s7 = scalar_lea.hbm %s2565_s3, %s2588_s8  ;;  %s230_s5 = scalar_lea.vmem [#allocation8], %s2033_s28 }
  0x71   : > { %1596 = dma.hbm_to_vmem [thread:$0]  (!%p2587_p2), %s2121_s14, 128, %s221_s30, %s2051_s11  }
  0x72   : > { %s237_s1 = sshll.u32 %s230_s5, 4  ;;  %s228_s12 = scalar_lea.sflag [#allocation9], %s2033_s28  ;;  %s238_s1 = int_to_ptr.vmem [resolvable:$true] %s237_s1 }
  0x73   : > { %s1802_s10 = scalar_lea.hbm %s2148_s7, 16  ;;  %s1807_s30 = scalar_lea.hbm %s2565_s3, 32 }
  0x74   : > { %p1803_p10 = scmp.ne.s32.totalorder %s2148_s7, %s1802_s10  ;;  %p1808_p5 = scmp.lt.u32.totalorder %s2148_s7, %s2565_s3 }
  0x75   : > { %p1809_p9 = scmp.lt.u32.totalorder %s1807_s30, %s1802_s10  ;;  %p1811_p11 = scmp.lt.u32.totalorder %s1802_s10, %s2148_s7 }
  0x76   : > { %p1805_p7 = pnand %p1803_p10, %p2057_p1 }
  0x77   : > { %p1810_p3 = por %p1809_p9, %p1808_p5 }
  0x78   : > { %p1806_p4 = pneg %p1805_p7 }
  0x79   : > { %p1812_p12 = por %p1811_p11, %p1810_p3 }
  0x7b   : > { %p1813_p8 = pnand %p1812_p12, %p1806_p4 }
  0x7d   : > { %1816 = shalt.err (!%p1813_p8)
}
  0x7e   : > { %s1817_s28 = scalar_lea.vmem %s238_s1, 16  ;;  %s1943_s8 = smov [#allocation8]  }
  0x7f   : > { %p1818_p13 = scmp.ne.s32.totalorder %s238_s1, %s1817_s28  ;;  %s1822_s6 = sshll.u32 %s1943_s8, 4  ;;  %s1823_s6 = int_to_ptr.vmem [resolvable:$false] %s1822_s6 }
  0x80   : > { %s1824_s9 = scalar_lea.vmem %s1823_s6, 32  ;;  %p1825_p10 = scmp.lt.s32.totalorder %s238_s1, %s1823_s6 }
  0x81   : > { %p1820_p6 = pnand %p1818_p13, %p2057_p1  ;;  %p1826_p7 = scmp.lt.s32.totalorder %s1824_s9, %s1817_s28 }
  0x83   : > { %p1821_p0 = pneg %p1820_p6  ;;  %p1827_p2 = por %p1826_p7, %p1825_p10 }
  0x85   : > { %p1828_p5 = pnand %p1827_p2, %p1821_p0 }
  0x87   : > { %1831 = shalt.err (!%p1828_p5)
}
  0x88   : > { %p2589_p9 = scmp.ne.s32.totalorder %s2579_s29, 0  ;;  %p2590_p4 = scmp.ne.s32.totalorder %s2582_s20, 0 }
  0x89   : > { %s2172_s13 = sand.u32 (!%p2590_p4), 1, %s1914_s16   ;;  %p2591_p1 = scmp.ne.s32.totalorder (!%p2590_p4), %s2576_s25, 0 }
  0x8a   : > { %1599 = dma.hbm_to_vmem [thread:$0]  (!%p2589_p9), %s2148_s7, 16, %s238_s1, %s228_s12  }
  0x8b   : > { %246 = sbr.rel (%p2590_p4) target bundleno = 1623 (0x657), region = 36  ;;  %s1527_s5 = sshll.u32 (!%p2590_p4), %s2172_s13, 3 }
  0x8c   : > { %s249_s10 = scalar_lea.sflag (!%p2590_p4), [#allocation3], %s2172_s13  ;;  %s252_s11 = scalar_lea.vmem (!%p2590_p4), [#allocation2], %s1527_s5 }
  0x92   : > { %1893 = dma.done.wait (%p2591_p1), %s249_s10, 128  }
  0x93   : > { %1895 = vsyncadd (%p2591_p1), %s249_s10, 4294967168  ;;  %s257_s29 = sand.u32 1, %s1999_s19   ;;  %s260_s7 = scalar_lea.vmem [#allocation5], %s2172_s13 }
  0x94   : > { %s258_s20 = scalar_lea.sflag [#allocation6], %s257_s29 }
  0x95   : > { %1897 = dma.done.wait (%p2591_p1), %s258_s20, 144  }
  0x96   : > { %1899 = vsyncadd (%p2591_p1), %s258_s20, 4294967152  ;;  %s269_s1 = scalar_lea.vmem [#allocation7], %s1527_s5  ;;  %s275_s12 = scalar_lea.sflag [#allocation9], %s2172_s13 }
  0x97   : > { %s277_s14 = scalar_lea.vmem [#allocation8], %s2172_s13 }
  0x98   : > { %1901 = dma.done.wait (%p2591_p1), %s275_s12, 16  }
  0x99   : > { %1903 = vsyncadd (%p2591_p1), %s275_s12, 4294967280  ;;  %vm383_vm0 = vcmask 1041409   ;;  %vm384_vm1 = vcmask 1042434   ;;  %vm386_vm2 = vcmask 1043459   ;;  %v1944_v0 = vmov 0.0   ;;  %v316_v2 = vld [vmem:[%s269_s1] sm:$0xff] }
  0x9a   : > { %1541 = vmatprep.subr.bf16.mxu0 %v1944_v0  ;;  %vm388_vm3 = vcmask 1044484   ;;  %vm390_vm4 = vcmask 1045509   ;;  %vm392_vm5 = vcmask 1046534   ;;  %vm394_vm6 = vcmask 1047559   ;;  %1547 = vmatprep.subr.bf16.mxu1 %v1944_v0  ;;  %v2194_v1 = vld [vmem:[%s277_s14] sm:$0x1] }
  0x9b   : > { %vm1945_vm7 = vmmov 0   ;;  %vm320_vm8 = vcmask 261120   ;;  %v315_v3 = vld [vmem:[%s252_s11] sm:$0xff]  ;;  %v528_v4 = vmax.f32 %v2194_v1, 1e-30  ;;  %v329_v5 = vpack.c.bf16 %v316_v2, %v316_v2  ;;  %s313_s9 = scalar_lea.vmem [#allocation10], %s2172_s13 }
  0x9c   : > { %1543 = vmatprep.mubr.msk.bf16.mxu0 %vm1945_vm7, %v1944_v0  ;;  %1549 = vmatprep.mubr.msk.bf16.mxu1 %vm1945_vm7, %v1944_v0  ;;  %v328_v6 = vpack.c.bf16 %v315_v3, %v315_v3  ;;  %v319_v7 = vmul.f32 %v315_v3, %v315_v3  ;;  %v324_v8 = vmul.f32 %v316_v2, %v316_v2  ;;  %vm527_vm9 = vcmp.gt.f32.partialorder %v2194_v1, 0.0  ;;  %v2217_v48 = vld [vmem:[%s260_s7] sm:$0x1]  ;;  %s1946_s8 = smov 0.05   ;;  %s2251_s5 = smov 0  }
  0x9d   : > { %1678 = vlog2.f32 %v528_v4  ;;  %v334_v9 = vsel %vm320_vm8, %v329_v5, 0  ;;  %v377_v16 = vlaneseq  ;;  %v523_v49 = vmax.f32 %v2217_v48, 1e-30 }
  0x9e   : > { %v331_v10 = vsel %vm320_vm8, %v328_v6, 0  ;;  %1542 = vmatpush3.bf16.xpose.msra.mxu0 %v334_v9  ;;  %v321_v11 = vsel %vm320_vm8, %v319_v7, 0.0  ;;  %v325_v12 = vsel %vm320_vm8, %v324_v8, 0.0  ;;  %vm539_vm11 = vcmask 64512  }
  0x9f   : > { %1548 = vmatpush3.bf16.xpose.msra.mxu1 %v331_v10  ;;  %1553 = vmatprep.subr.bf16.mxu0 %v1944_v0  ;;  %v378_v18 = vand.u32 127, %v377_v16  ;;  %v2208_v19 = vshrl.u32 %v377_v16, 7 }
  0xa0   : > { %322 = vadd.xlane.f32.xlu0 %v321_v11 }
  0xa1   : > { %v2211_v20 = vsub.s32 %v378_v18, %v2208_v19  ;;  %v2234_v7 = vsub.s32 0, %v2208_v19 }
  0xa4   : > { %326 = vadd.xlane.f32.xlu0 %v325_v12 }
  0xa5   : > { %1544 = vmatmul.mubr.msk.bf16.vlgmr.msra.gmra.mrb[0].mxu0 %vm320_vm8, %v328_v6 }
  0xa6   : > { %1550 = vmatmul.mubr.msk.bf16.vlgmr.msra.gmra.mrb[0].mxu1 %vm320_vm8, %v328_v6  ;;  %1554 = vmatpush3.bf16.xpose.msra.mxu0 %v334_v9 }
  0xa7   : > { %1555 = vmatprep.mubr.msk.bf16.mxu0 %vm1945_vm7, %v1944_v0  ;;  %v1679_v13 = vpop.eup %1678 }
  0xa8   : > { %v530_v14 = vmul.f32 0.6931472, %v1679_v13 }
  0xaa   : > { %v2205_v15 = vsel %vm527_vm9, %v530_v14, -1e+09 }
  0xad   : > { %1556 = vmatmul.mubr.msk.bf16.vlgmr.msra.gmra.mrb[4].mxu0 %vm320_vm8, %v329_v5  ;;  %vm522_vm8 = vcmp.gt.f32.partialorder %v2217_v48, 0.0 }
 0x12d   : > { %v323_v17 = vpop.xlane.xlu0 %322 }
 0x12e   : > { %v452_v22 = vrot.slane %v323_v17, %v2211_v20 }
 0x130   : > { %v460_v26 = vadd.f32 %v452_v22, %v323_v17 }
 0x131   : > { %v327_v21 = vpop.xlane.xlu0 %326 }
 0x132   : > { %v382_v23 = vrot.slane %v327_v21, %v2211_v20 }
 0x134   : > { %v397_v27 = vadd.f32 %v382_v23, %v323_v17  ;;  %v511_v41 = vadd.f32 %v382_v23, %v327_v21 }
 0x178   : > { %v370_v24 = vpop.f32.mrb[0].mxu0 }
 0x179   : > { %v442_v25 = vpop.f32.mrb[0].mxu1  ;;  %v398_v28 = vmul.f32 2.0, %v370_v24  ;;  %v1545_v30 = vpop.f32.mrb[1].mxu0 }
 0x17a   : > { %v461_v29 = vmul.f32 2.0, %v442_v25  ;;  %v1551_v31 = vpop.f32.mrb[1].mxu1  ;;  %v373_v32 = vpop.f32.mrb[2].mxu0 }
 0x17b   : > { %v445_v33 = vpop.f32.mrb[2].mxu1  ;;  %v399_v34 = vsub.f32 %v397_v27, %v398_v28  ;;  %v1546_v36 = vpop.f32.mrb[3].mxu0 }
 0x17c   : > { %v462_v35 = vsub.f32 %v460_v26, %v461_v29  ;;  %v1552_v37 = vpop.f32.mrb[3].mxu1  ;;  %v2247_v36 = vmov 0.0  }
 0x17d   : > { %v400_v38 = vmax.f32 %v399_v34, 0.0  ;;  %v2249_v37 = vmov 0.0  }
 0x17e   : > { %v463_v39 = vmax.f32 %v462_v35, 0.0  ;;  %v2245_v35 = vmov 0.0  }
 0x17f   : > { %1680 = vrsqrt.f32 %v400_v38  ;;  %vm403_vm10 = vcmp.eq.f32.partialorder %v400_v38, inf  ;;  %v406_v53 = vand.u32 2147483648, %v400_v38  ;;  %vm405_vm12 = vcmp.eq.f32.partialorder %v400_v38, 0.0 }
 0x180   : > { %v505_v40 = vpop.f32.mrb[4].mxu0  ;;  %1682 = vrsqrt.f32 %v463_v39  ;;  %vm466_vm13 = vcmp.eq.f32.partialorder %v463_v39, inf  ;;  %v469_v58 = vand.u32 2147483648, %v463_v39  ;;  %vm468_vm14 = vcmp.eq.f32.partialorder %v463_v39, 0.0 }
 0x181   : > { %v512_v42 = vmul.f32 2.0, %v505_v40  ;;  %v1557_v43 = vpop.f32.mrb[5].mxu0 }
 0x182   : > { %v508_v44 = vpop.f32.mrb[6].mxu0 }
 0x183   : > { %v513_v45 = vsub.f32 %v511_v41, %v512_v42  ;;  %v1558_v46 = vpop.f32.mrb[7].mxu0 }
 0x185   : > { %v514_v47 = vmax.f32 %v513_v45, 0.0 }
 0x187   : > { %1684 = vrsqrt.f32 %v514_v47  ;;  %vm517_vm15 = vcmp.eq.f32.partialorder %v514_v47, inf  ;;  %v520_v0 = vand.u32 2147483648, %v514_v47  ;;  %vm519_vm7 = vcmp.eq.f32.partialorder %v514_v47, 0.0 }
 0x188   : > { %1686 = vlog2.f32 %v523_v49 }
 0x189   : > { %v1681_v50 = vpop.eup %1680 }
 0x18a   : > { %v1683_v51 = vpop.eup %1682  ;;  %v402_v52 = vmul.f32 %v1681_v50, %v400_v38 }
 0x18b   : > { %v465_v54 = vmul.f32 %v1683_v51, %v463_v39 }
 0x18c   : > { %v404_v55 = vsel %vm403_vm10, %v400_v38, %v402_v52 }
 0x18d   : > { %v2220_v56 = vsel %vm405_vm12, %v406_v53, %v404_v55  ;;  %v467_v57 = vsel %vm466_vm13, %v463_v39, %v465_v54 }
 0x18e   : > { %v540_v59 = vsel %vm539_vm11, %v2220_v56, -inf  ;;  %v2224_v60 = vsel %vm468_vm14, %v469_v58, %v467_v57 }
 0x18f   : > { %541 = vmax.xlane.f32.xlu1 %v540_v59  ;;  %v550_v62 = vsel %vm539_vm11, %v2224_v60, -inf }
 0x191   : > { %v1685_v61 = vpop.eup %1684 }
 0x192   : > { %v516_v63 = vmul.f32 %v1685_v61, %v514_v47  ;;  %v1687_v4 = vpop.eup %1686 }
 0x193   : > { %551 = vmax.xlane.f32.xlu1 %v550_v62  ;;  %v525_v6 = vmul.f32 0.6931472, %v1687_v4 }
 0x194   : > { %v518_v2 = vsel %vm517_vm15, %v514_v47, %v516_v63 }
 0x195   : > { %v2228_v3 = vsel %vm519_vm7, %v520_v0, %v518_v2  ;;  %v526_v8 = vsel %vm522_vm8, %v525_v6, -1e+09 }
 0x196   : > { %v560_v5 = vsel %vm539_vm11, %v2228_v3, -inf  ;;  %v2237_v9 = vrot.slane %v526_v8, %v2234_v7 }
 0x197   : > { %561 = vmax.xlane.f32.xlu0 %v560_v5 }
 0x1a4   : > { %537 = vbcast.lane.b32.xlu1 %v2237_v9, 256 }
 0x21c   : > { %v542_v10 = vpop.xlane.xlu1 %541 }
 0x21d   : > { %v543_v11 = vrot.slane %v542_v10, 4 }
 0x21f   : > { %v544_v12 = vmax.f32 %v542_v10, %v543_v11 }
 0x220   : > { %v552_v13 = vpop.xlane.xlu1 %551 }
 0x221   : > { %v545_v14 = vrot.slane %v544_v12, 2  ;;  %v553_v16 = vrot.slane %v552_v13, 4 }
 0x223   : > { %v554_v17 = vmax.f32 %v552_v13, %v553_v16  ;;  %v546_v18 = vmax.f32 %v544_v12, %v545_v14 }
 0x224   : > { %v562_v21 = vpop.xlane.xlu0 %561  ;;  %v2240_v22 = vpop.permute.xlu1 %537 }
 0x225   : > { %v555_v23 = vrot.slane %v554_v17, 2  ;;  %v563_v24 = vrot.slane %v562_v21, 4  ;;  %v547_v25 = vrot.slane %v546_v18, 1 }
 0x227   : > { %v564_v26 = vmax.f32 %v562_v21, %v563_v24  ;;  %v548_v27 = vmax.f32 %v546_v18, %v547_v25  ;;  %v556_v28 = vmax.f32 %v554_v17, %v555_v23 }
 0x229   : > { %v565_v29 = vrot.slane %v564_v26, 2  ;;  %1559 = vpush %v548_v27  ;;  %v557_v30 = vrot.slane %v556_v28, 1 }
 0x22b   : > { %v566_v31 = vmax.f32 %v564_v26, %v565_v29  ;;  %v558_v32 = vmax.f32 %v556_v28, %v557_v30 }
 0x22d   : > { %1561 = vpush %v558_v32  ;;  %v567_v33 = vrot.slane %v566_v31, 1 }
 0x22f   : > { %v568_v34 = vmax.f32 %v566_v31, %v567_v33 }
 0x231   : > { %1563 = vpush %v568_v34 }
 0x25a   : > { %s1560_s25 = spop %1559 }
 0x25e   : > { %s1562_s30 = spop %1561 }
 0x262   : > { %s1564_s23 = spop %1563 }
 0x263   : > { %s570_s22 = smax.f32 %s1564_s23, %s1562_s30 }
 0x264   : > { %s571_s28 = smax.f32 %s1560_s25, %s570_s22 }
 0x265   : > { %s2242_s6 = smax.f32 %s1946_s8, %s571_s28 }
 0x266 LB: >> { %v705_v38 = vrot.slane %v2228_v3, %v2234_v7  ;;  %v649_v39 = vrot.slane %v2224_v60, %v2234_v7  ;;  %v2270_v40 = vsub.s32 1, %v2208_v19  ;;  %v2277_v43 = vsub.s32 2, %v2208_v19  ;;  %s583_s10 = scvt.s32.f32 %s1938_s5  ;;  %s1948_s7 = smov 0.05   ;;  %s1938_s5 = sphi %s2251_s5, %s578_s5   ;;  %v1934_v37 = vphi %v2249_v37, %v2596_v37   ;;  %v1930_v36 = vphi %v2247_v36, %v2595_v36   ;;  %v1926_v35 = vphi %v2245_v35, %v2594_v35  }
 0x267   : >> { %v2285_v46 = vsub.s32 3, %v2208_v19  ;;  %v1947_v50 = vmov 0   ;;  %v2292_v53 = vsub.s32 4, %v2208_v19  ;;  %v2299_v57 = vsub.s32 5, %v2208_v19  ;;  %s578_s5 = sadd.s32 1, %s1938_s5  }
 0x268   : >> { %707 = vbcast.lane.b32.xlu1 %v705_v38, 256  ;;  %651 = vbcast.lane.b32.xlu0 %v649_v39, 256  ;;  %v712_v41 = vrot.slane %v2228_v3, %v2270_v40  ;;  %v656_v42 = vrot.slane %v2224_v60, %v2270_v40  ;;  %s584_s11 = smul.f32 -0.6931472, %s583_s10  ;;  %v719_v44 = vrot.slane %v2228_v3, %v2277_v43  ;;  %v2306_v61 = vsub.s32 6, %v2208_v19  ;;  %p575_p2 = scmp.ge.s32.totalorder %s578_s5, 20  }
 0x269   : >> { %v663_v45 = vrot.slane %v2224_v60, %v2277_v43  ;;  %1689 = vset.pattern.permute.xlu1 %v1947_v50  ;;  %1688 = vset.pattern.permute.xlu0 %v1947_v50  ;;  %v726_v51 = vrot.slane %v2228_v3, %v2285_v46  ;;  %v670_v52 = vrot.slane %v2224_v60, %v2285_v46  ;;  %v2313_v2 = vsub.s32 7, %v2208_v19  ;;  %s1532_s5 = sshll.u32 (%p575_p2), %s1999_s19, 4  ;;  %s1362_s19 = scalar_lea.sflag (%p575_p2), [#allocation4], %s2172_s13 }
 0x26a   : >> { %v585_v47 = vstv %s584_s11  ;;  %v733_v54 = vrot.slane %v2228_v3, %v2292_v53  ;;  %v677_v55 = vrot.slane %v2224_v60, %v2292_v53  ;;  %v740_v58 = vrot.slane %v2228_v3, %v2299_v57  ;;  %p2597_p11 = scmp.ne.s32.totalorder (%p575_p2), %s2577_s26, 0 }
 0x26b   : >> { %v586_v49 = vmul.f32 1.442695, %v585_v47  ;;  %v684_v59 = vrot.slane %v2224_v60, %v2299_v57  ;;  %v747_v63 = vrot.slane %v2228_v3, %v2306_v61  ;;  %v691_v0 = vrot.slane %v2224_v60, %v2306_v61 }
 0x26c   : >> { %714 = vbcast.lane.b32.xlu1 %v712_v41, 256  ;;  %658 = vbcast.lane.b32.xlu0 %v656_v42, 256  ;;  %v754_v4 = vrot.slane %v2228_v3, %v2313_v2  ;;  %v698_v5 = vrot.slane %v2224_v60, %v2313_v2 }
 0x26d   : >> { %1690 = vpow2.f32 %v586_v49 }
 0x270   : >> { %721 = vbcast.lane.b32.xlu1 %v719_v44, 256  ;;  %665 = vbcast.lane.b32.xlu0 %v663_v45, 256 }
 0x274   : >> { %728 = vbcast.lane.b32.xlu1 %v726_v51, 256  ;;  %672 = vbcast.lane.b32.xlu0 %v670_v52, 256 }
 0x277   : >> { %v1691_v62 = vpop.eup %1690 }
 0x278   : >> { %735 = vbcast.lane.b32.xlu1 %v733_v54, 256  ;;  %679 = vbcast.lane.b32.xlu0 %v677_v55, 256  ;;  %1565 = vpush %v1691_v62 }
 0x27c   : >> { %742 = vbcast.lane.b32.xlu1 %v740_v58, 256  ;;  %686 = vbcast.lane.b32.xlu0 %v684_v59, 256 }
 0x280   : >> { %749 = vbcast.lane.b32.xlu1 %v747_v63, 256  ;;  %693 = vbcast.lane.b32.xlu0 %v691_v0, 256 }
 0x284   : >> { %756 = vbcast.lane.b32.xlu1 %v754_v4, 256  ;;  %700 = vbcast.lane.b32.xlu0 %v698_v5, 256 }
 0x2a9   : >> { %s1566_s29 = spop %1565 }
 0x2aa   : >> { %s589_s20 = smul.f32 %s1566_s29, %s2242_s6  ;;  %s1374_s29 = sshll.u32 (%p575_p2), %s313_s9, 4  ;;  %s2518_s29 = int_to_ptr.vmem [resolvable:$true] %s1374_s29 }
 0x2ac   : >> { %s2320_s1 = smax.f32 %s1948_s7, %s589_s20 }
 0x2ad   : >> { %v591_v6 = vstv %s2320_s1  ;;  %s596_s14 = ssub.f32 0.0, %s2320_s1 }
 0x2ae   : >> { %1692 = vrcp.f32 %v591_v6 }
 0x2b8   : >> { %v1693_v8 = vpop.eup %1692 }
 0x2b9   : >> { %1567 = vpush %v1693_v8 }
 0x2da   : >> { %v708_v10 = vpop.permute.xlu1 %707  ;;  %v652_v11 = vpop.permute.xlu0 %651 }
 0x2db   : >> { %v774_v23 = vsub.f32 %v1930_v36, %v652_v11  ;;  %v782_v25 = vsub.f32 %v1926_v35, %v708_v10 }
 0x2de   : >> { %v715_v12 = vpop.permute.xlu1 %714  ;;  %v659_v13 = vpop.permute.xlu0 %658 }
 0x2df   : >> { %v775_v17 = vsub.f32 %v1930_v36, %v659_v13  ;;  %v783_v26 = vsub.f32 %v1926_v35, %v715_v12 }
 0x2e2   : >> { %v722_v14 = vpop.permute.xlu1 %721  ;;  %v666_v16 = vpop.permute.xlu0 %665 }
 0x2e3   : >> { %v784_v31 = vsub.f32 %v1926_v35, %v722_v14  ;;  %v776_v32 = vsub.f32 %v1930_v36, %v666_v16 }
 0x2e6   : >> { %v729_v18 = vpop.permute.xlu1 %728  ;;  %v673_v21 = vpop.permute.xlu0 %672 }
 0x2e7   : >> { %v785_v38 = vsub.f32 %v1926_v35, %v729_v18  ;;  %v777_v39 = vsub.f32 %v1930_v36, %v673_v21 }
 0x2ea   : >> { %s1568_s12 = spop %1567  ;;  %v736_v29 = vpop.permute.xlu1 %735  ;;  %v680_v30 = vpop.permute.xlu0 %679 }
 0x2eb   : >> { %v2325_v24 = vstv %s1568_s12  ;;  %v786_v47 = vsub.f32 %v1926_v35, %v736_v29  ;;  %v778_v49 = vsub.f32 %v1930_v36, %v680_v30  ;;  %s2516_s12 = scalar_lea.hbm (%p575_p2), %s2566_s4, %s1532_s5 }
 0x2ec   : >> { %v791_v27 = vmul.f32 %v775_v17, %v2325_v24  ;;  %v790_v28 = vmul.f32 %v774_v23, %v2325_v24  ;;  %v799_v33 = vmul.f32 %v783_v26, %v2325_v24  ;;  %v798_v34 = vmul.f32 %v782_v25, %v2325_v24 }
 0x2ed   : >> { %v800_v41 = vmul.f32 %v784_v31, %v2325_v24  ;;  %v792_v42 = vmul.f32 %v776_v32, %v2325_v24  ;;  %v801_v50 = vmul.f32 %v785_v38, %v2325_v24  ;;  %v793_v51 = vmul.f32 %v777_v39, %v2325_v24 }
 0x2ee   : >> { %838 = vperm.xlu1 %1689, %v791_v27   ;;  %835 = vperm.xlu0 %1688, %v790_v28   ;;  %v743_v44 = vpop.permute.xlu1 %742  ;;  %v687_v45 = vpop.permute.xlu0 %686  ;;  %v802_v59 = vmul.f32 %v786_v47, %v2325_v24  ;;  %v794_v62 = vmul.f32 %v778_v49, %v2325_v24  ;;  %v597_v17 = vmul.f32 %v1934_v37, %v2325_v24 }
 0x2ef   : >> { %v787_v55 = vsub.f32 %v1926_v35, %v743_v44  ;;  %v779_v58 = vsub.f32 %v1930_v36, %v687_v45  ;;  %v2363_v23 = vmul.f32 %v2325_v24, %v2220_v56 }
 0x2f0   : >> { %v598_v18 = vadd.f32 %v597_v17, %v2205_v15 }
 0x2f1   : >> { %v803_v63 = vmul.f32 %v787_v55, %v2325_v24  ;;  %v795_v0 = vmul.f32 %v779_v58, %v2325_v24 }
 0x2f2   : >> { %862 = vperm.xlu0 %1688, %v799_v33   ;;  %859 = vperm.xlu1 %1689, %v798_v34   ;;  %v750_v52 = vpop.permute.xlu1 %749  ;;  %v694_v54 = vpop.permute.xlu0 %693  ;;  %v603_v21 = vrot.slane %v598_v18, %v2234_v7 }
 0x2f3   : >> { %v788_v4 = vsub.f32 %v1926_v35, %v750_v52  ;;  %v780_v5 = vsub.f32 %v1930_v36, %v694_v54 }
 0x2f4   : >> { %v605_v25 = vsub.f32 %v603_v21, %v2363_v23 }
 0x2f5   : >> { %v804_v10 = vmul.f32 %v788_v4, %v2325_v24  ;;  %v796_v11 = vmul.f32 %v780_v5, %v2325_v24 }
 0x2f6   : >> { %865 = vperm.xlu0 %1688, %v800_v41   ;;  %841 = vperm.xlu1 %1689, %v792_v42   ;;  %v757_v6 = vpop.permute.xlu1 %756  ;;  %v701_v8 = vpop.permute.xlu0 %700  ;;  %v606_v26 = vsel %vm539_vm11, %v605_v25, -inf }
 0x2f7   : >> { %v789_v12 = vsub.f32 %v1926_v35, %v757_v6  ;;  %v781_v13 = vsub.f32 %v1930_v36, %v701_v8 }
 0x2f9   : >> { %v805_v14 = vmul.f32 %v789_v12, %v2325_v24  ;;  %v797_v16 = vmul.f32 %v781_v13, %v2325_v24 }
 0x2fa   : >> { %868 = vperm.xlu0 %1688, %v801_v50   ;;  %844 = vperm.xlu1 %1689, %v793_v51  }
 0x2fe   : >> { %871 = vperm.xlu0 %1688, %v802_v59   ;;  %847 = vperm.xlu1 %1689, %v794_v62  }
 0x302   : >> { %874 = vperm.xlu0 %1688, %v803_v63   ;;  %850 = vperm.xlu1 %1689, %v795_v0  }
 0x306   : >> { %877 = vperm.xlu0 %1688, %v804_v10   ;;  %853 = vperm.xlu1 %1689, %v796_v11  }
 0x30a   : >> { %880 = vperm.xlu0 %1688, %v805_v14   ;;  %856 = vperm.xlu1 %1689, %v797_v16  }
 0x32e   : >> { %607 = vmax.xlane.f32.xlu1 %v606_v26 }
 0x36d   : >> { %v839_v27 = vpop.permute.xlu1 %838  ;;  %v836_v28 = vpop.permute.xlu0 %835 }
 0x36e   : >> { %v889_v42 = vrot.slane %v839_v27, %v2211_v20  ;;  %v885_v44 = vrot.slane %v836_v28, %v2211_v20 }
 0x370   : >> { %v946_v62 = vsel %vm383_vm0, %v889_v42, %v885_v44 }
 0x371   : >> { %v863_v29 = vpop.permute.xlu0 %862  ;;  %v860_v30 = vpop.permute.xlu1 %859 }
 0x372   : >> { %v921_v45 = vrot.slane %v863_v29, %v2211_v20  ;;  %v917_v47 = vrot.slane %v860_v30, %v2211_v20  ;;  %v815_v30 = vrot.slane %v2205_v15, %v2234_v7 }
 0x374   : >> { %v953_v63 = vsel %vm383_vm0, %v921_v45, %v917_v47  ;;  %vm1099_vm0 = vcmask (%p575_p2), 57344  }
 0x375   : >> { %v866_v31 = vpop.permute.xlu0 %865  ;;  %v842_v32 = vpop.permute.xlu1 %841 }
 0x376   : >> { %v925_v49 = vrot.slane %v866_v31, %v2211_v20  ;;  %v893_v50 = vrot.slane %v842_v32, %v2211_v20 }
 0x378   : >> { %v954_v5 = vsel %vm384_vm1, %v925_v49, %v953_v63  ;;  %v947_v6 = vsel %vm384_vm1, %v893_v50, %v946_v62  ;;  %vm1359_vm1 = vcmask (%p575_p2), 0  }
 0x379   : >> { %v869_v37 = vpop.permute.xlu0 %868  ;;  %v845_v33 = vpop.permute.xlu1 %844 }
 0x37a   : >> { %v929_v51 = vrot.slane %v869_v37, %v2211_v20  ;;  %v897_v52 = vrot.slane %v845_v33, %v2211_v20 }
 0x37c   : >> { %v955_v11 = vsel %vm386_vm2, %v929_v51, %v954_v5  ;;  %v948_v12 = vsel %vm386_vm2, %v897_v52, %v947_v6  ;;  %v618_v5 = vstv %s596_s14  ;;  %s1951_s14 = smov (%p575_p2), 0.0  }
 0x37d   : >> { %v872_v34 = vpop.permute.xlu0 %871  ;;  %v848_v38 = vpop.permute.xlu1 %847 }
 0x37e   : >> { %v933_v54 = vrot.slane %v872_v34, %v2211_v20  ;;  %v901_v55 = vrot.slane %v848_v38, %v2211_v20 }
 0x380   : >> { %v956_v13 = vsel %vm388_vm3, %v933_v54, %v955_v11  ;;  %v949_v14 = vsel %vm388_vm3, %v901_v55, %v948_v12 }
 0x381   : >> { %v875_v39 = vpop.permute.xlu0 %874  ;;  %v851_v41 = vpop.permute.xlu1 %850 }
 0x382   : >> { %v937_v0 = vrot.slane %v875_v39, %v2211_v20  ;;  %v905_v4 = vrot.slane %v851_v41, %v2211_v20 }
 0x384   : >> { %v957_v18 = vsel %vm390_vm4, %v937_v0, %v956_v13  ;;  %v950_v21 = vsel %vm390_vm4, %v905_v4, %v949_v14 }
 0x385   : >> { %v878_v58 = vpop.permute.xlu0 %877  ;;  %v854_v59 = vpop.permute.xlu1 %853 }
 0x386   : >> { %v941_v8 = vrot.slane %v878_v58, %v2211_v20  ;;  %v909_v10 = vrot.slane %v854_v59, %v2211_v20 }
 0x388   : >> { %v958_v28 = vsel %vm392_vm5, %v941_v8, %v957_v18  ;;  %v951_v29 = vsel %vm392_vm5, %v909_v10, %v950_v21 }
 0x389   : >> { %v881_v16 = vpop.permute.xlu0 %880  ;;  %v857_v17 = vpop.permute.xlu1 %856 }
 0x38a   : >> { %v945_v26 = vrot.slane %v881_v16, %v2211_v20  ;;  %v913_v27 = vrot.slane %v857_v17, %v2211_v20 }
 0x38c   : >> { %v959_v31 = vsel %vm394_vm6, %v945_v26, %v958_v28  ;;  %v952_v32 = vsel %vm394_vm6, %v913_v27, %v951_v29 }
 0x38d   : >> { %v962_v37 = vadd.f32 %v952_v32, %v2237_v9  ;;  %v963_v34 = vadd.f32 %v959_v31, %v815_v30 }
 0x38f   : >> { %v964_v33 = vsel %vm539_vm11, %v962_v37, -inf  ;;  %v967_v38 = vsel %vm539_vm11, %v963_v34, -inf }
 0x390   : >> { %965 = vmax.xlane.f32.xlu0 %v964_v33 }
 0x394   : >> { %968 = vmax.xlane.f32.xlu0 %v967_v38 }
 0x3bb   : >> { %v608_v39 = vpop.xlane.xlu1 %607 }
 0x3bc   : >> { %v609_v41 = vsub.f32 %v605_v25, %v608_v39 }
 0x3be   : >> { %v610_v42 = vmul.f32 1.442695, %v609_v41 }
 0x3c0   : >> { %1694 = vpow2.f32 %v610_v42 }
 0x3ca   : >> { %v1695_v44 = vpop.eup %1694 }
 0x3cb   : >> { %v612_v45 = vsel %vm539_vm11, %v1695_v44, 0.0 }
 0x3cc   : >> { %613 = vadd.xlane.f32.xlu1 %v612_v45 }
 0x41d   : >> { %v966_v47 = vpop.xlane.xlu0 %965 }
 0x41e   : >> { %v970_v49 = vsub.f32 %v962_v37, %v966_v47 }
 0x420   : >> { %v972_v50 = vmul.f32 1.442695, %v970_v49 }
 0x421   : >> { %v969_v51 = vpop.xlane.xlu0 %968 }
 0x422   : >> { %1696 = vpow2.f32 %v972_v50  ;;  %v971_v52 = vsub.f32 %v963_v34, %v969_v51 }
 0x424   : >> { %v974_v54 = vmul.f32 1.442695, %v971_v52 }
 0x426   : >> { %1698 = vpow2.f32 %v974_v54 }
 0x42c   : >> { %v1697_v55 = vpop.eup %1696 }
 0x42d   : >> { %v976_v58 = vsel %vm539_vm11, %v1697_v55, 0.0 }
 0x42e   : >> { %977 = vadd.xlane.f32.xlu0 %v976_v58 }
 0x430   : >> { %v1699_v25 = vpop.eup %1698 }
 0x431   : >> { %v979_v59 = vsel %vm539_vm11, %v1699_v25, 0.0 }
 0x432   : >> { %980 = vadd.xlane.f32.xlu1 %v979_v59 }
 0x459   : >> { %v614_v62 = vpop.xlane.xlu1 %613 }
 0x45a   : >> { %1700 = vlog2.f32 %v614_v62 }
 0x464   : >> { %v1701_v63 = vpop.eup %1700 }
 0x465   : >> { %v616_v0 = vmul.f32 0.6931472, %v1701_v63 }
 0x467   : >> { %v617_v4 = vadd.f32 %v616_v0, %v608_v39 }
 0x469   : >> { %v2406_v6 = vmul.f32 %v618_v5, %v617_v4  ;;  %v1949_v4 = vmov (%p575_p2), 0  }
 0x46a   : > { %1710 = vset.pattern.permute.xlu0 (%p575_p2), %v1949_v4  ;;  %1711 = vset.pattern.permute.xlu1 (%p575_p2), %v1949_v4 }
 0x46b   : >> { %v620_v8 = vmul.f32 %v2406_v6, %v2325_v24  ;;  %v1006_v0 = vrot.slane (%p575_p2), %v2406_v6, %v2277_v43  ;;  %v1022_v15 = vrot.slane (%p575_p2), %v2406_v6, %v2306_v61  ;;  %v1026_v56 = vrot.slane (%p575_p2), %v2406_v6, %v2313_v2 }
 0x46d   : >> { %v621_v10 = vadd.f32 %v620_v8, %v2240_v22  ;;  %v1014_v8 = vrot.slane (%p575_p2), %v2406_v6, %v2292_v53 }
 0x46f   : >> { %v622_v11 = vsub.f32 %v621_v10, %v2363_v23  ;;  %v1018_v10 = vrot.slane (%p575_p2), %v2406_v6, %v2299_v57 }
 0x471   : >> { %v623_v12 = vsel %vm539_vm11, %v622_v11, -inf  ;;  %v1029_v22 = vcombine.low (%p575_p2), %v1014_v8, %v1018_v10 }
 0x472   : >> { %v624_v13 = vrot.slane %v623_v12, 4 }
 0x474   : >> { %v625_v14 = vmax.f32 %v623_v12, %v624_v13  ;;  %v1030_v12 = vcombine.low (%p575_p2), %v1022_v15, %v1026_v56 }
 0x476   : >> { %v626_v16 = vrot.slane %v625_v14, 2 }
 0x478   : >> { %v627_v17 = vmax.f32 %v625_v14, %v626_v16 }
 0x47a   : >> { %v628_v18 = vrot.slane %v627_v17, 1 }
 0x47c   : >> { %v629_v21 = vmax.f32 %v627_v17, %v628_v18 }
 0x47e   : >> { %v630_v26 = vsub.f32 %v622_v11, %v629_v21 }
 0x480   : >> { %v631_v27 = vmul.f32 1.442695, %v630_v26 }
 0x482   : >> { %1702 = vpow2.f32 %v631_v27 }
 0x48c   : >> { %v1703_v28 = vpop.eup %1702 }
 0x48d   : >> { %v633_v29 = vsel %vm539_vm11, %v1703_v28, 0.0 }
 0x48e   : >> { %v634_v30 = vrot.slane %v633_v29, 4 }
 0x490   : >> { %v635_v24 = vadd.f32 %v634_v30, %v633_v29 }
 0x492   : >> { %v636_v31 = vrot.slane %v635_v24, 2 }
 0x494   : >> { %v637_v32 = vadd.f32 %v636_v31, %v635_v24 }
 0x496   : >> { %v638_v37 = vrot.slane %v637_v32, 1 }
 0x498   : >> { %v639_v23 = vadd.f32 %v638_v37, %v637_v32 }
 0x49a   : >> { %1704 = vlog2.f32 %v639_v23 }
 0x4a4   : >> { %v1705_v33 = vpop.eup %1704 }
 0x4a5   : >> { %v641_v34 = vmul.f32 0.6931472, %v1705_v33 }
 0x4a7   : >> { %v642_v38 = vadd.f32 %v641_v34, %v629_v21 }
 0x4a9   : >> { %v2414_v37 = vmul.f32 %v642_v38, %v618_v5  }
 0x4ab   : >> { %v2592_v39 = vmov %v2414_v37 }
 0x4ac   : >> { %v2596_v37 = vmov %v2592_v39  ;;  %v1110_v56 = vmul.f32 (%p575_p2), %v2592_v39, %v2194_v1 }
 0x4bb   : >> { %v978_v41 = vpop.xlane.xlu0 %977 }
 0x4bc   : >> { %1706 = vlog2.f32 %v978_v41 }
 0x4bf   : >> { %v981_v42 = vpop.xlane.xlu1 %980 }
 0x4c0   : >> { %1708 = vlog2.f32 %v981_v42 }
 0x4c6   : >> { %v1707_v44 = vpop.eup %1706 }
 0x4c7   : >> { %v983_v45 = vmul.f32 0.6931472, %v1707_v44 }
 0x4c9   : >> { %v986_v49 = vadd.f32 %v983_v45, %v966_v47  ;;  %v998_v47 = vrot.slane (%p575_p2), %v2406_v6, %v2234_v7 }
 0x4ca   : >> { %v1709_v50 = vpop.eup %1708 }
 0x4cb   : >> { %v988_v52 = vmul.f32 %v986_v49, %v618_v5  ;;  %v985_v54 = vmul.f32 0.6931472, %v1709_v50 }
 0x4cd   : >> { %v990_v55 = vadd.f32 %v1930_v36, %v988_v52  ;;  %v987_v58 = vadd.f32 %v985_v54, %v969_v51  ;;  %v1002_v51 = vrot.slane (%p575_p2), %v2406_v6, %v2270_v40 }
 0x4cf   : >> { %v2417_v36 = vmul.f32 0.5, %v990_v55   ;;  %v989_v59 = vmul.f32 %v987_v58, %v618_v5  ;;  %577 = sbr.rel (!%p575_p2) target bundleno = 614 (0x266), region = 125  ;;  %v1010_v5 = vrot.slane (%p575_p2), %v2406_v6, %v2285_v46  ;;  %v1027_v60 = vcombine.low (%p575_p2), %v998_v47, %v1002_v51 }
 0x4d1   : >> { %v2593_v25 = vmov %v2417_v36  ;;  %v991_v62 = vadd.f32 %v1926_v35, %v989_v59  ;;  %v1028_v9 = vcombine.low (%p575_p2), %v1006_v0, %v1010_v5 }
 0x4d2   : >> { %v2595_v36 = vmov %v2593_v25  ;;  %v1126_v28 = vrot.slane (%p575_p2), %v2593_v25, %v2234_v7  ;;  %v1130_v29 = vrot.slane (%p575_p2), %v2593_v25, %v2270_v40  ;;  %v1134_v32 = vrot.slane (%p575_p2), %v2593_v25, %v2277_v43 }
 0x4d3   : >> { %v993_v63 = vmul.f32 0.5, %v991_v62   ;;  %v1138_v37 = vrot.slane (%p575_p2), %v2593_v25, %v2285_v46  ;;  %v1142_v23 = vrot.slane (%p575_p2), %v2593_v25, %v2292_v53 }
 0x4d4   : > { %v1155_v44 = vcombine.low (%p575_p2), %v1126_v28, %v1130_v29 }
 0x4d5   : >> { %v2594_v35 = vmov %v993_v63  ;;  %v1242_v3 = vrot.slane (%p575_p2), %v993_v63, %v2234_v7  ;;  %v1246_v11 = vrot.slane (%p575_p2), %v993_v63, %v2270_v40  ;;  %v1250_v13 = vrot.slane (%p575_p2), %v993_v63, %v2277_v43 }
 0x4d6   : > { %v1950_v35 = vmov 1966171168   ;;  %v1254_v14 = vrot.slane %v993_v63, %v2285_v46  ;;  %v1258_v16 = vrot.slane %v993_v63, %v2292_v53  ;;  %v1262_v6 = vrot.slane %v993_v63, %v2299_v57 }
 0x4d7   : > { %v1032_v36 = vunpack.c.l.s4 %v1950_v35  ;;  %v1266_v18 = vrot.slane %v993_v63, %v2306_v61  ;;  %v1270_v21 = vrot.slane %v993_v63, %v2313_v2  ;;  %v1271_v26 = vcombine.low %v1242_v3, %v1246_v11 }
 0x4d8   : > { %v1272_v27 = vcombine.low %v1250_v13, %v1254_v14  ;;  %v1273_v24 = vcombine.low %v1258_v16, %v1262_v6  ;;  %v1146_v7 = vrot.slane %v2593_v25, %v2299_v57  ;;  %v1150_v40 = vrot.slane %v2593_v25, %v2306_v61 }
 0x4d9   : > { %v1033_v17 = vunpack.c.0.s8 %v1032_v36  ;;  %v1274_v31 = vcombine.low %v1266_v18, %v1270_v21  ;;  %v1154_v61 = vrot.slane %v2593_v25, %v2313_v2  ;;  %v1156_v50 = vcombine.low %v1134_v32, %v1138_v37 }
 0x4da   : > { %v1157_v52 = vcombine.low %v1142_v23, %v1146_v7 }
 0x4db   : > { %v2460_v30 = vsub.s32 %v1033_v17, %v2208_v19  ;;  %v1158_v58 = vcombine.low %v1150_v40, %v1154_v61 }
 0x4dd   : > { %v1037_v19 = vrot.slane %v1027_v60, %v2460_v30  ;;  %v1044_v33 = vrot.slane %v1028_v9, %v2460_v30  ;;  %v1051_v34 = vrot.slane %v1029_v22, %v2460_v30  ;;  %v1058_v43 = vrot.slane %v1030_v12, %v2460_v30 }
 0x4de   : > { %v1281_v38 = vrot.slane %v1271_v26, %v2460_v30  ;;  %v1288_v46 = vrot.slane %v1272_v27, %v2460_v30  ;;  %v1295_v53 = vrot.slane %v1273_v24, %v2460_v30  ;;  %v1302_v41 = vrot.slane %v1274_v31, %v2460_v30 }
 0x4df   : > { %v1059_v57 = vcombine.low %v1037_v19, %v1044_v33  ;;  %v1060_v42 = vcombine.low %v1051_v34, %v1058_v43  ;;  %v1165_v59 = vrot.slane %v1155_v44, %v2460_v30  ;;  %v1172_v47 = vrot.slane %v1156_v50, %v2460_v30 }
 0x4e0   : > { %v1303_v45 = vcombine.low %v1281_v38, %v1288_v46  ;;  %v1304_v49 = vcombine.low %v1295_v53, %v1302_v41  ;;  %v1179_v2 = vrot.slane %v1157_v52, %v2460_v30  ;;  %v1186_v51 = vrot.slane %v1158_v58, %v2460_v30 }
 0x4e1   : > { %v1067_v54 = vrot.slane %v1059_v57, %v2460_v30  ;;  %v1074_v55 = vrot.slane %v1060_v42, %v2460_v30  ;;  %v1187_v4 = vcombine.low %v1165_v59, %v1172_v47  ;;  %v1111_v60 = vsel %vm1099_vm0, %v1110_v56, 0.0 }
 0x4e2   : > { %v1311_v62 = vrot.slane %v1303_v45, %v2460_v30  ;;  %v1318_v63 = vrot.slane %v1304_v49, %v2460_v30  ;;  %v1188_v5 = vcombine.low %v1179_v2, %v1186_v51 }
 0x4e3   : > { %v1075_v25 = vcombine.low %v1067_v54, %v1074_v55  ;;  %v1195_v8 = vrot.slane %v1187_v4, %v2460_v30 }
 0x4e4   : > { %v1319_v0 = vcombine.low %v1311_v62, %v1318_v63  ;;  %v1202_v10 = vrot.slane %v1188_v5, %v2460_v30 }
 0x4e5   : > { %1077 = vperm.xlu0 %1710, %v1075_v25  }
 0x4e6   : > { %1321 = vperm.xlu1 %1711, %v1319_v0   ;;  %v1203_v15 = vcombine.low %v1195_v8, %v1202_v10 }
 0x4e9   : > { %1205 = vperm.xlu0 %1710, %v1203_v15  }
 0x508   : > { %1112 = vadd.xlane.f32.xlu0 %v1111_v60 }
 0x564   : > { %v1078_v3 = vpop.permute.xlu0 %1077 }
 0x565   : > { %v1082_v9 = vrot.slane %v1078_v3, %v2211_v20  ;;  %v1322_v22 = vpop.permute.xlu1 %1321 }
 0x566   : > { %v1326_v35 = vrot.slane %v1322_v22, %v2211_v20 }
 0x567   : > { %v1089_v36 = vrot.slane %v1082_v9, %v2460_v30 }
 0x568   : > { %v1333_v11 = vrot.slane %v1326_v35, %v2460_v30  ;;  %v1206_v13 = vpop.permute.xlu0 %1205 }
 0x569   : > { %v1096_v12 = vrot.slane %v1089_v36, %v2460_v30  ;;  %v1210_v39 = vrot.slane %v1206_v13, %v2211_v20 }
 0x56a   : > { %v1340_v14 = vrot.slane %v1333_v11, %v2460_v30 }
 0x56b   : > { %v1098_v16 = vmul.f32 %v1096_v12, %v2217_v48  ;;  %v1217_v6 = vrot.slane %v1210_v39, %v2460_v30 }
 0x56c   : > { %v1342_v17 = vmul.f32 %v1340_v14, %v2194_v1 }
 0x56d   : > { %v1100_v18 = vsel %vm1099_vm0, %v1098_v16, 0.0  ;;  %v1224_v26 = vrot.slane %v1217_v6, %v2460_v30 }
 0x56e   : > { %1101 = vadd.xlane.f32.xlu1 %v1100_v18  ;;  %v1343_v21 = vsel %vm1099_vm0, %v1342_v17, 0.0 }
 0x56f   : > { %v1226_v27 = vmul.f32 %v1224_v26, %v2217_v48 }
 0x571   : > { %v1227_v28 = vsel %vm1099_vm0, %v1226_v27, 0.0 }
 0x572   : > { %1344 = vadd.xlane.f32.xlu1 %v1343_v21  ;;  %1228 = vadd.xlane.f32.xlu0 %v1227_v28 }
 0x595   : > { %v1113_v20 = vpop.xlane.xlu0 %1112 }
 0x596   : > { %v1114_v29 = vrot.slane %v1113_v20, 4 }
 0x598   : > { %v1115_v24 = vadd.f32 %v1114_v29, %v1113_v20 }
 0x59a   : > { %v1116_v31 = vrot.slane %v1115_v24, 2 }
 0x59c   : > { %v1117_v7 = vadd.f32 %v1116_v31, %v1115_v24 }
 0x59e   : > { %v1118_v48 = vrot.slane %v1117_v7, 1 }
 0x5a0   : > { %v1119_v61 = vadd.f32 %v1118_v48, %v1117_v7 }
 0x5fb   : > { %v1102_v1 = vpop.xlane.xlu1 %1101 }
 0x5fc   : > { %v1103_v32 = vrot.slane %v1102_v1, 4 }
 0x5fe   : > { %v1104_v37 = vadd.f32 %v1103_v32, %v1102_v1 }
 0x5ff   : > { %v1345_v23 = vpop.xlane.xlu1 %1344  ;;  %v1229_v33 = vpop.xlane.xlu0 %1228 }
 0x600   : > { %v1105_v40 = vrot.slane %v1104_v37, 2  ;;  %v1346_v19 = vrot.slane %v1345_v23, 4  ;;  %v1230_v30 = vrot.slane %v1229_v33, 4 }
 0x602   : > { %v1347_v34 = vadd.f32 %v1346_v19, %v1345_v23  ;;  %v1106_v43 = vadd.f32 %v1105_v40, %v1104_v37  ;;  %v1231_v46 = vadd.f32 %v1230_v30, %v1229_v33 }
 0x604   : > { %v1348_v38 = vrot.slane %v1347_v34, 2  ;;  %v1107_v53 = vrot.slane %v1106_v43, 1  ;;  %v1232_v57 = vrot.slane %v1231_v46, 2 }
 0x606   : > { %v1349_v41 = vadd.f32 %v1348_v38, %v1347_v34  ;;  %v1108_v42 = vadd.f32 %v1107_v53, %v1106_v43  ;;  %v1233_v44 = vadd.f32 %v1232_v57, %v1231_v46 }
 0x608   : > { %1569 = vpush %v1108_v42  ;;  %v1350_v45 = vrot.slane %v1349_v41, 1  ;;  %v1234_v49 = vrot.slane %v1233_v44, 1 }
 0x609   : > { %1571 = vpush %v1119_v61 }
 0x60a   : > { %v1351_v50 = vadd.f32 %v1350_v45, %v1349_v41  ;;  %v1235_v52 = vadd.f32 %v1234_v49, %v1233_v44 }
 0x60c   : > { %1573 = vpush %v1235_v52 }
 0x60d   : > { %1575 = vpush %v1351_v50 }
 0x639   : > { %s1570_s25 = spop %1569 }
 0x63a   : > { %s1572_s30 = spop %1571 }
 0x63b   : > { %s1121_s10 = sadd.f32 %s1572_s30, %s1570_s25  ;;  %s1832_s25 = scalar_lea.vmem %s2518_s29, 16 }
 0x63c   : > { %p1833_p3 = scmp.ne.s32.totalorder %s2518_s29, %s1832_s25  ;;  %s1952_s30 = smov [#allocation10]  }
 0x63d   : > { %s1574_s23 = spop %1573 }
 0x63e   : > { %s1237_s22 = smul.f32 2.0, %s1574_s23  ;;  %s1576_s28 = spop %1575 }
 0x63f   : > { %s1353_s8 = smul.f32 2.0, %s1576_s28  ;;  %p1834_p12 = pnand %p1833_p3, %p2597_p11 }
 0x640   : > { %s1836_s23 = sshll.u32 %s1952_s30, 4  ;;  %s1837_s23 = int_to_ptr.vmem [resolvable:$false] %s1836_s23 }
 0x641   : > { %s1354_s6 = sadd.f32 %s1353_s8, %s1237_s22  ;;  %p1835_p8 = pneg %p1834_p12 }
 0x642   : > { %s1838_s22 = scalar_lea.vmem %s1837_s23, 32  ;;  %p1839_p13 = scmp.lt.s32.totalorder %s2518_s29, %s1837_s23 }
 0x643   : > { %s1355_s11 = smul.f32 0.5, %s1354_s6  ;;  %p1840_p6 = scmp.lt.s32.totalorder %s1838_s22, %s1832_s25 }
 0x645   : > { %s1356_s20 = ssub.f32 %s1121_s10, %s1355_s11  ;;  %p1841_p0 = por %p1840_p6, %p1839_p13 }
 0x647   : > { %s1357_s0 = smax.f32 %s1951_s14, %s1356_s20  ;;  %p1842_p10 = pnand %p1841_p0, %p1835_p8 }
 0x648   : > { %v1358_v54 = vstv %s1357_s0 }
 0x649   : > { %1360 = vst.msk [vmem:[%s313_s9] sm:$0x1] %vm1359_vm1, %v1358_v54 }
 0x64a   : > { %1845 = shalt.err (!%p1842_p10)
}
 0x64b   : > { %s1846_s0 = scalar_lea.hbm %s2516_s12, 16  ;;  %s1850_s28 = scalar_lea.hbm %s2566_s4, 32 }
 0x64c   : > { %p1847_p7 = scmp.ne.s32.totalorder %s2516_s12, %s1846_s0  ;;  %p1851_p4 = scmp.lt.u32.totalorder %s2516_s12, %s2566_s4 }
 0x64d   : > { %p1852_p1 = scmp.lt.u32.totalorder %s1850_s28, %s1846_s0  ;;  %p1854_p3 = scmp.lt.u32.totalorder %s1846_s0, %s2516_s12 }
 0x64e   : > { %p1848_p5 = pnand %p1847_p7, %p2597_p11 }
 0x64f   : > { %p1853_p2 = por %p1852_p1, %p1851_p4 }
 0x650   : > { %p1849_p9 = pneg %p1848_p5 }
 0x651   : > { %p1855_p12 = por %p1854_p3, %p1853_p2 }
 0x653   : > { %p1856_p8 = pnand %p1855_p12, %p1849_p9 }
 0x655   : > { %1859 = shalt.err (!%p1856_p8)
}
 0x656   : > { %1585 = dma.vmem_to_hbm [thread:$0]  (%p2597_p11), %s2518_s29, 16, %s2516_s12, %s1362_s19  }
 0x657 PF: > { %s1386_s5 = sand.u32 1, %s1910_s15   ;;  %p2598_p13 = scmp.ne.s32.totalorder %s2578_s27, 0 }
 0x658   : > { %p2599_p6 = scmp.ge.s32.totalorder %s1922_s18, 2  ;;  %s1387_s10 = scalar_lea.sflag [#allocation4], %s1386_s5 }
 0x65a   : > { %p1601_p0 = pnand %p2599_p6, %p2598_p13 }
 0x65c   : > { %1905 = dma.done.wait (!%p1601_p0), %s1387_s10, 16  }
 0x65d   : > { %1907 = vsyncadd (!%p1601_p0), %s1387_s10, 4294967280  ;;  %p23_p10 = scmp.ge.s32.totalorder %s2003_s21, 4   ;;  %s2600_s15 = smov %s1914_s16 }
 0x65e   : > { %s2601_s16 = smov %s1918_s17  ;;  %s2602_s17 = smov %s2015_s24 }
 0x65f   : > { %s2603_s18 = smov %s2003_s21  ;;  %25 = sbr.rel (!%p23_p10) target bundleno = 12 (0xc), region = 136 }
 0x666   :  { %1391 = vsyncpa [#allocation3], 1 }
 0x667   :  { %1393 = vsyncpa [#allocation3 + $0x1], 1 }
 0x668   :  { %1394 = vsyncpa [#allocation6], 1 }
 0x669   :  { %1396 = vsyncpa [#allocation6 + $0x1], 1 }
 0x66a   :  { %1397 = vsyncpa [#allocation9], 1 }
 0x66b   :  { %1399 = vsyncpa [#allocation9 + $0x1], 1 }
 0x66c   :  { %1400 = vsyncpa [#allocation4], 1 }
 0x66d   :  { %1402 = vsyncpa [#allocation4 + $0x1], 1 }

</bundles_post_ra>
